<compile_context>
chip_gen: v7x
topology: tpu7x:2x2x1
jax: 0.10.0
libtpu: 0.0.40
codegen_flags: <defaults>
</compile_context>

<pallas_src>
import functools
import math

import jax
import jax.numpy as jnp
from jax import lax
from jax.experimental import pallas as pl
from jax.experimental.pallas import tpu as pltpu


def _cpc_block_kernel(z_ref, c_ref, w_ref, b_ref, idx_ref, out_ref, *,
                      length, n_negatives, inv_sqrt_zdim):
    """One (batch-block, prediction-step k) tile of the CPC loss.

    Block shapes seen by the kernel:
      z_ref   : (Bb, T, z_dim)     full sequences for the batch block
      c_ref   : (Bb, L, c_dim)     context, trimmed to the first L frames
      w_ref   : (z_dim, c_dim)     predictor-k weight (nn.Linear layout)
      b_ref   : (z_dim, 1)         predictor-k bias
      idx_ref : (Bb, N, L)         int32 negative indices for (k, batch block)
      out_ref : (8, 128)           dense tile; row 0 = sum of CE terms,
                                   row 1 = number of correct predictions
    """
    k = pl.program_id(1)                       # 0-based prediction step
    shift = k + 1                              # positive target is z[:, t + k + 1]
    bb, t_full, _ = z_ref.shape

    w = w_ref[...].astype(jnp.float32)         # (z, c)
    bias = b_ref[...].astype(jnp.float32)      # (z, 1)

    src_iota = lax.broadcasted_iota(jnp.int32, (t_full, length), 0)
    tgt_iota = lax.broadcasted_iota(jnp.int32, (t_full, length), 1)

    def per_batch(b, carry):
        ce_acc, corr_acc = carry
        cb = c_ref[b].astype(jnp.float32)      # (L, c)
        zb = z_ref[b].astype(jnp.float32)      # (T, z)
        idx_b = idx_ref[b]                     # (N, L) int32

        # Wc^T (pre-scaled by 1/sqrt(z_dim)): contract c_dim of both operands,
        # no materialized transpose.
        wc_t = lax.dot_general(w, cb, (((1,), (1,)), ((), ())),
                               preferred_element_type=jnp.float32)      # (z, L)
        wc_t = (wc_t + bias) * inv_sqrt_zdim

        # Full score matrix over every source frame; the k-shift is folded into
        # the selection masks below (no unaligned slice of z).
        #   S[s, t] = <z[b, s], Wc[b, t]> / sqrt(z_dim)
        s_mat = lax.dot_general(zb, wc_t, (((1,), (0,)), ((), ())),
                                preferred_element_type=jnp.float32)     # (T, L)

        # Positive score: offset diagonal S[t + k + 1, t].
        f_pos = jnp.sum(jnp.where(src_iota == tgt_iota + shift, s_mat, 0.0),
                        axis=0, keepdims=True)                          # (1, L)

        # Negative scores: independent one-hot row gathers (no serial carry).
        f_negs = []
        for j in range(n_negatives):
            sel = idx_b[j:j + 1, :] + shift                             # (1, L)
            f_negs.append(jnp.sum(jnp.where(src_iota == sel, s_mat, 0.0),
                                  axis=0, keepdims=True))               # (1, L)

        # Single-pass softmax over {positive} ∪ {negatives}.
        max_neg = functools.reduce(jnp.maximum, f_negs)
        m = jnp.maximum(f_pos, max_neg)
        sum_exp = jnp.exp(f_pos - m)
        for f_j in f_negs:
            sum_exp = sum_exp + jnp.exp(f_j - m)
        ce = (m + jnp.log(sum_exp)) - f_pos                             # (1, L)
        # argmax over classes == 0; exact ties count as correct (argmax-first
        # semantics, same as torch/jnp).
        correct = (f_pos >= max_neg).astype(jnp.float32)

        return (ce_acc + jnp.sum(ce, keepdims=True),
                corr_acc + jnp.sum(correct, keepdims=True))

    init = (jnp.zeros((1, 1), jnp.float32), jnp.zeros((1, 1), jnp.float32))
    ce_sum, corr_sum = lax.fori_loop(0, bb, per_batch, init, unroll=True)

    # One dense, lane-full (8, 128) store per (batch-block, k) — no masked
    # partial stores and no per-position HBM round trip.
    row8 = lax.broadcasted_iota(jnp.int32, (8, 128), 0)
    out_ref[...] = jnp.where(row8 == 0, ce_sum,
                             jnp.where(row8 == 1, corr_sum, 0.0))


def make_seq_index(key, n_prediction_steps, batch, n_negatives, length):
    """Mirror of the module's negative-index construction:
    (randint(1, L) + arange(L)) mod L  -> negative index never equals the positive."""
    rand = jax.random.randint(
        key, (n_prediction_steps, batch, n_negatives, length), 1, length,
        dtype=jnp.int32)
    return (rand + jnp.arange(length, dtype=jnp.int32)) % length


@functools.partial(jax.jit, static_argnames=("batch_block",))
def cpc_loss_same_seq(z, c, pred_weights, pred_biases, seq_index, *,
                      batch_block=None):
    """Forward pass of CPCLoss_sameSeq.

    z            : (B, T, z_dim)
    c            : (B, T, c_dim)
    pred_weights : (K, z_dim, c_dim)   stacked nn.Linear weights
    pred_biases  : (K, z_dim)          stacked nn.Linear biases
    seq_index    : (K, B, n_negatives, T - K) int32

    Returns (loss: (), accuracies: (K,)).
    """
    B, T, z_dim = z.shape
    K, z_dim_w, c_dim = pred_weights.shape
    _, _, n_neg, length = seq_index.shape
    assert z_dim_w == z_dim and length == T - K

    if batch_block is None:
        # Fuse several batch elements per grid step (amortize the per-step
        # pipeline overhead) while keeping >=2 blocks along the parallel batch
        # axis when possible (v7x: 2 TensorCores share a chip).
        batch_block = B if (B % 2 or B < 4) else B // 2
    assert B % batch_block == 0
    n_bblocks = B // batch_block

    c_trim = c[:, :length, :]                     # == c[:, :-K, :]
    biases = pred_biases.reshape(K, z_dim, 1)

    kernel = functools.partial(
        _cpc_block_kernel, length=length, n_negatives=n_neg,
        inv_sqrt_zdim=1.0 / math.sqrt(z_dim))

    cost = pl.CostEstimate(
        flops=2 * B * K * length * z_dim * (c_dim + T),
        transcendentals=B * K * length * (n_neg + 2),
        bytes_accessed=4 * (B * T * z_dim + B * length * c_dim
                            + n_bblocks * K * (z_dim * c_dim + z_dim)
                            + K * B * n_neg * length
                            + n_bblocks * K * 8 * 128))

    # Grid order (batch_blocks, K): the large per-batch z/c blocks are
    # invariant over the inner k axis (fetched once per batch block); only the
    # small W_k / bias / idx blocks are re-streamed per step.
    partials = pl.pallas_call(
        kernel,
        grid=(n_bblocks, K),
        in_specs=[
            pl.BlockSpec((batch_block, T, z_dim), lambda b, k: (b, 0, 0)),       # z block
            pl.BlockSpec((batch_block, length, c_dim), lambda b, k: (b, 0, 0)),  # c block
            pl.BlockSpec((None, z_dim, c_dim), lambda b, k: (k, 0, 0)),          # W_k
            pl.BlockSpec((None, z_dim, 1), lambda b, k: (k, 0, 0)),              # bias_k
            pl.BlockSpec((None, batch_block, n_neg, length),
                         lambda b, k: (k, b, 0, 0)),                             # idx[k, blk]
        ],
        out_specs=pl.BlockSpec((None, None, 8, 128), lambda b, k: (b, k, 0, 0)),
        out_shape=jax.ShapeDtypeStruct((n_bblocks, K, 8, 128), jnp.float32),
        compiler_params=pltpu.CompilerParams(
            dimension_semantics=("parallel", "parallel")),
        cost_estimate=cost,
    )(z, c_trim, pred_weights, biases, seq_index)

    # Tiny epilogue on the already-reduced per-(batch-block, k) partial sums.
    denom = float(B * length)
    losses = jnp.sum(partials[:, :, 0, 0], axis=0) / denom      # (K,) per-step CE mean
    accuracies = jnp.sum(partials[:, :, 1, 0], axis=0) / denom  # (K,)
    loss = jnp.mean(losses)
    return loss, accuracies


def _cpc_loss_reference(z, c, pred_weights, pred_biases, seq_index):
    """Pure-JAX transcription of the PyTorch forward (verification only)."""
    B, T, z_dim = z.shape
    K = pred_weights.shape[0]
    length = T - K
    c_trim = c[:, :length, :]
    batch_idx = jnp.arange(B)[:, None, None]
    inv = 1.0 / math.sqrt(z_dim)
    losses, accs = [], []
    for k in range(1, K + 1):
        z_shift = z[:, k:length + k, :]                                      # (B, L, z)
        wc = jnp.einsum("blc,dc->bld", c_trim, pred_weights[k - 1],
                        precision=jax.lax.Precision.HIGHEST) + pred_biases[k - 1]
        idx = seq_index[k - 1]                                               # (B, N, L)
        z_neg = z_shift[batch_idx, idx, :]                                   # (B, N, L, z)
        zs = jnp.concatenate([z_shift[:, None, :, :], z_neg], axis=1)        # (B, 1+N, L, z)
        f = jnp.sum(zs * wc[:, None, :, :] * inv, axis=-1)                   # (B, 1+N, L)
        logp = jax.nn.log_softmax(f, axis=1)
        losses.append(-jnp.mean(logp[:, 0, :]))
        accs.append(jnp.mean((jnp.argmax(f, axis=1) == 0).astype(jnp.float32)))
    return jnp.mean(jnp.stack(losses)), jnp.stack(accs)


if __name__ == "__main__":
    # Full-f32 matmuls everywhere so the MXU kernel and the XLA reference agree tightly.
    jax.config.update("jax_default_matmul_precision", "highest")

    # Small config consistent with the module's forward.
    n_speakers_per_batch = 2
    n_utterances_per_speaker = 2
    n_prediction_steps = 3
    n_negatives = 8
    z_dim = 32
    c_dim = 32
    T = 16
    B = n_speakers_per_batch * n_utterances_per_speaker   # z.shape[0] in the module
    length = T - n_prediction_steps

    key = jax.random.PRNGKey(0)
    kz, kc, kw, kb, ki = jax.random.split(key, 5)
    z = jax.random.normal(kz, (B, T, z_dim), dtype=jnp.float32)
    c = jax.random.normal(kc, (B, T, c_dim), dtype=jnp.float32)
    bound = 1.0 / math.sqrt(c_dim)   # nn.Linear default init range
    pred_weights = jax.random.uniform(kw, (n_prediction_steps, z_dim, c_dim),
                                      jnp.float32, -bound, bound)
    pred_biases = jax.random.uniform(kb, (n_prediction_steps, z_dim),
                                     jnp.float32, -bound, bound)
    seq_index = make_seq_index(ki, n_prediction_steps, B, n_negatives, length)

    loss, accuracies = jax.block_until_ready(
        cpc_loss_same_seq(z, c, pred_weights, pred_biases, seq_index,
                          batch_block=2))

    ref_loss, ref_acc = _cpc_loss_reference(z, c, pred_weights, pred_biases, seq_index)

    assert loss.shape == () and accuracies.shape == (n_prediction_steps,)
    assert bool(jnp.isfinite(loss))
    assert jnp.allclose(loss, ref_loss, rtol=1e-4, atol=1e-5), (loss, ref_loss)
    assert jnp.allclose(accuracies, ref_acc, atol=1e-2), (accuracies, ref_acc)

    print("KERNEL_OK")
</pallas_src>

<mosaic_0001>
module attributes {stable_mosaic.version = 11 : i64} {
  func.func @_cpc_block_kernel(%arg0: i32, %arg1: i32, %arg2: memref<2x16x32xf32, #tpu.memory_space<vmem>>, %arg3: memref<2x13x32xf32, #tpu.memory_space<vmem>>, %arg4: memref<1x32x32xf32, #tpu.memory_space<vmem>>, %arg5: memref<1x32x1xf32, #tpu.memory_space<vmem>>, %arg6: memref<1x2x8x13xi32, #tpu.memory_space<vmem>>, %arg7: memref<1x1x8x128xf32, #tpu.memory_space<vmem>>) attributes {dimension_semantics = [#tpu.dimension_semantics<parallel>, #tpu.dimension_semantics<parallel>], iteration_bounds = array<i64: 2, 3>, scalar_prefetch = 0 : i64, scratch_operands = 0 : i64, tpu.core_type = #tpu.core_type<tc>, window_params = [{transform_indices = @transform_0, window_bounds = array<i64: 2, 16, 32>}, {transform_indices = @transform_1, window_bounds = array<i64: 2, 13, 32>}, {transform_indices = @transform_2, window_bounds = array<i64: 1, 32, 32>}, {transform_indices = @transform_3, window_bounds = array<i64: 1, 32, 1>}, {transform_indices = @transform_4, window_bounds = array<i64: 1, 2, 8, 13>}, {transform_indices = @transform_5, window_bounds = array<i64: 1, 1, 8, 128>}]} {
    %c1_i32 = arith.constant 1 : i32
    %0 = arith.addi %arg1, %c1_i32 : i32
    %c0 = arith.constant 0 : index
    %c0_0 = arith.constant 0 : index
    %c0_1 = arith.constant 0 : index
    %1 = vector.load %arg4[%c0, %c0_0, %c0_1] : memref<1x32x32xf32, #tpu.memory_space<vmem>>, vector<1x32x32xf32>
    %2 = vector.shape_cast %1 : vector<1x32x32xf32> to vector<32x32xf32>
    %c0_2 = arith.constant 0 : index
    %c0_3 = arith.constant 0 : index
    %c0_4 = arith.constant 0 : index
    %3 = vector.load %arg5[%c0_2, %c0_3, %c0_4] : memref<1x32x1xf32, #tpu.memory_space<vmem>>, vector<1x32x1xf32>
    %4 = vector.shape_cast %3 : vector<1x32x1xf32> to vector<32x1xf32>
    %5 = tpu.iota {dimensions = array<i32: 0>} : vector<16x13xi32>
    %6 = tpu.iota {dimensions = array<i32: 1>} : vector<16x13xi32>
    %cst = arith.constant 0.000000e+00 : f32
    %7 = vector.broadcast %cst : f32 to vector<1x1xf32>
    %cst_5 = arith.constant 0.000000e+00 : f32
    %8 = vector.broadcast %cst_5 : f32 to vector<1x1xf32>
    %c0_i32 = arith.constant 0 : i32
    %9 = arith.index_cast %c0_i32 : i32 to index
    %c0_6 = arith.constant 0 : index
    %c0_7 = arith.constant 0 : index
    %10 = vector.load %arg3[%9, %c0_6, %c0_7] : memref<2x13x32xf32, #tpu.memory_space<vmem>>, vector<1x13x32xf32>
    %11 = vector.shape_cast %10 : vector<1x13x32xf32> to vector<13x32xf32>
    %12 = arith.index_cast %c0_i32 : i32 to index
    %c0_8 = arith.constant 0 : index
    %c0_9 = arith.constant 0 : index
    %13 = vector.load %arg2[%12, %c0_8, %c0_9] : memref<2x16x32xf32, #tpu.memory_space<vmem>>, vector<1x16x32xf32>
    %14 = vector.shape_cast %13 : vector<1x16x32xf32> to vector<16x32xf32>
    %c0_10 = arith.constant 0 : index
    %15 = arith.index_cast %c0_i32 : i32 to index
    %c0_11 = arith.constant 0 : index
    %c0_12 = arith.constant 0 : index
    %16 = vector.load %arg6[%c0_10, %15, %c0_11, %c0_12] : memref<1x2x8x13xi32, #tpu.memory_space<vmem>>, vector<1x1x8x13xi32>
    %17 = vector.shape_cast %16 : vector<1x1x8x13xi32> to vector<8x13xi32>
    %cst_13 = arith.constant dense<0.000000e+00> : vector<32x13xf32>
    %18 = tpu.matmul %2, %11, %cst_13 {dimension_numbers = #tpu.dot_dimension_numbers<[1], [1], [0], [0], [0, 0, 1, 0], [], []>, precision = #tpu.contract_precision<fp32>} : vector<32x32xf32>, vector<13x32xf32>, vector<32x13xf32> -> vector<32x13xf32>
    %19 = vector.broadcast %4 : vector<32x1xf32> to vector<32x13xf32>
    %20 = arith.addf %18, %19 : vector<32x13xf32>
    %cst_14 = arith.constant 0.176776692 : f32
    %21 = vector.broadcast %cst_14 : f32 to vector<32x13xf32>
    %22 = arith.mulf %20, %21 : vector<32x13xf32>
    %cst_15 = arith.constant dense<0.000000e+00> : vector<16x13xf32>
    %23 = tpu.matmul %14, %22, %cst_15 {dimension_numbers = #tpu.dot_dimension_numbers<[1], [0], [0], [1], [0, 0, 1, 1], [], []>, precision = #tpu.contract_precision<fp32>} : vector<16x32xf32>, vector<32x13xf32>, vector<16x13xf32> -> vector<16x13xf32>
    %24 = vector.broadcast %0 : i32 to vector<16x13xi32>
    %25 = arith.addi %6, %24 : vector<16x13xi32>
    %26 = arith.cmpi eq, %5, %25 : vector<16x13xi32>
    %cst_16 = arith.constant 0.000000e+00 : f32
    %27 = vector.broadcast %cst_16 : f32 to vector<16x13xf32>
    %28 = arith.select %26, %23, %27 : vector<16x13xi1>, vector<16x13xf32>
    %cst_17 = arith.constant dense<0.000000e+00> : vector<13xf32>
    %29 = vector.multi_reduction <add>, %28, %cst_17 [0] : vector<16x13xf32> to vector<13xf32>
    %30 = vector.shape_cast %29 : vector<13xf32> to vector<1x13xf32>
    %31 = vector.extract_strided_slice %17 {offsets = [0, 0], sizes = [1, 13], strides = [1, 1]} : vector<8x13xi32> to vector<1x13xi32>
    %32 = vector.broadcast %0 : i32 to vector<1x13xi32>
    %33 = arith.addi %31, %32 : vector<1x13xi32>
    %34 = vector.broadcast %33 : vector<1x13xi32> to vector<16x13xi32>
    %35 = arith.cmpi eq, %5, %34 : vector<16x13xi32>
    %cst_18 = arith.constant 0.000000e+00 : f32
    %36 = vector.broadcast %cst_18 : f32 to vector<16x13xf32>
    %37 = arith.select %35, %23, %36 : vector<16x13xi1>, vector<16x13xf32>
    %cst_19 = arith.constant dense<0.000000e+00> : vector<13xf32>
    %38 = vector.multi_reduction <add>, %37, %cst_19 [0] : vector<16x13xf32> to vector<13xf32>
    %39 = vector.shape_cast %38 : vector<13xf32> to vector<1x13xf32>
    %40 = vector.extract_strided_slice %17 {offsets = [1, 0], sizes = [1, 13], strides = [1, 1]} : vector<8x13xi32> to vector<1x13xi32>
    %41 = vector.broadcast %0 : i32 to vector<1x13xi32>
    %42 = arith.addi %40, %41 : vector<1x13xi32>
    %43 = vector.broadcast %42 : vector<1x13xi32> to vector<16x13xi32>
    %44 = arith.cmpi eq, %5, %43 : vector<16x13xi32>
    %cst_20 = arith.constant 0.000000e+00 : f32
    %45 = vector.broadcast %cst_20 : f32 to vector<16x13xf32>
    %46 = arith.select %44, %23, %45 : vector<16x13xi1>, vector<16x13xf32>
    %cst_21 = arith.constant dense<0.000000e+00> : vector<13xf32>
    %47 = vector.multi_reduction <add>, %46, %cst_21 [0] : vector<16x13xf32> to vector<13xf32>
    %48 = vector.shape_cast %47 : vector<13xf32> to vector<1x13xf32>
    %49 = vector.extract_strided_slice %17 {offsets = [2, 0], sizes = [1, 13], strides = [1, 1]} : vector<8x13xi32> to vector<1x13xi32>
    %50 = vector.broadcast %0 : i32 to vector<1x13xi32>
    %51 = arith.addi %49, %50 : vector<1x13xi32>
    %52 = vector.broadcast %51 : vector<1x13xi32> to vector<16x13xi32>
    %53 = arith.cmpi eq, %5, %52 : vector<16x13xi32>
    %cst_22 = arith.constant 0.000000e+00 : f32
    %54 = vector.broadcast %cst_22 : f32 to vector<16x13xf32>
    %55 = arith.select %53, %23, %54 : vector<16x13xi1>, vector<16x13xf32>
    %cst_23 = arith.constant dense<0.000000e+00> : vector<13xf32>
    %56 = vector.multi_reduction <add>, %55, %cst_23 [0] : vector<16x13xf32> to vector<13xf32>
    %57 = vector.shape_cast %56 : vector<13xf32> to vector<1x13xf32>
    %58 = vector.extract_strided_slice %17 {offsets = [3, 0], sizes = [1, 13], strides = [1, 1]} : vector<8x13xi32> to vector<1x13xi32>
    %59 = vector.broadcast %0 : i32 to vector<1x13xi32>
    %60 = arith.addi %58, %59 : vector<1x13xi32>
    %61 = vector.broadcast %60 : vector<1x13xi32> to vector<16x13xi32>
    %62 = arith.cmpi eq, %5, %61 : vector<16x13xi32>
    %cst_24 = arith.constant 0.000000e+00 : f32
    %63 = vector.broadcast %cst_24 : f32 to vector<16x13xf32>
    %64 = arith.select %62, %23, %63 : vector<16x13xi1>, vector<16x13xf32>
    %cst_25 = arith.constant dense<0.000000e+00> : vector<13xf32>
    %65 = vector.multi_reduction <add>, %64, %cst_25 [0] : vector<16x13xf32> to vector<13xf32>
    %66 = vector.shape_cast %65 : vector<13xf32> to vector<1x13xf32>
    %67 = vector.extract_strided_slice %17 {offsets = [4, 0], sizes = [1, 13], strides = [1, 1]} : vector<8x13xi32> to vector<1x13xi32>
    %68 = vector.broadcast %0 : i32 to vector<1x13xi32>
    %69 = arith.addi %67, %68 : vector<1x13xi32>
    %70 = vector.broadcast %69 : vector<1x13xi32> to vector<16x13xi32>
    %71 = arith.cmpi eq, %5, %70 : vector<16x13xi32>
    %cst_26 = arith.constant 0.000000e+00 : f32
    %72 = vector.broadcast %cst_26 : f32 to vector<16x13xf32>
    %73 = arith.select %71, %23, %72 : vector<16x13xi1>, vector<16x13xf32>
    %cst_27 = arith.constant dense<0.000000e+00> : vector<13xf32>
    %74 = vector.multi_reduction <add>, %73, %cst_27 [0] : vector<16x13xf32> to vector<13xf32>
    %75 = vector.shape_cast %74 : vector<13xf32> to vector<1x13xf32>
    %76 = vector.extract_strided_slice %17 {offsets = [5, 0], sizes = [1, 13], strides = [1, 1]} : vector<8x13xi32> to vector<1x13xi32>
    %77 = vector.broadcast %0 : i32 to vector<1x13xi32>
    %78 = arith.addi %76, %77 : vector<1x13xi32>
    %79 = vector.broadcast %78 : vector<1x13xi32> to vector<16x13xi32>
    %80 = arith.cmpi eq, %5, %79 : vector<16x13xi32>
    %cst_28 = arith.constant 0.000000e+00 : f32
    %81 = vector.broadcast %cst_28 : f32 to vector<16x13xf32>
    %82 = arith.select %80, %23, %81 : vector<16x13xi1>, vector<16x13xf32>
    %cst_29 = arith.constant dense<0.000000e+00> : vector<13xf32>
    %83 = vector.multi_reduction <add>, %82, %cst_29 [0] : vector<16x13xf32> to vector<13xf32>
    %84 = vector.shape_cast %83 : vector<13xf32> to vector<1x13xf32>
    %85 = vector.extract_strided_slice %17 {offsets = [6, 0], sizes = [1, 13], strides = [1, 1]} : vector<8x13xi32> to vector<1x13xi32>
    %86 = vector.broadcast %0 : i32 to vector<1x13xi32>
    %87 = arith.addi %85, %86 : vector<1x13xi32>
    %88 = vector.broadcast %87 : vector<1x13xi32> to vector<16x13xi32>
    %89 = arith.cmpi eq, %5, %88 : vector<16x13xi32>
    %cst_30 = arith.constant 0.000000e+00 : f32
    %90 = vector.broadcast %cst_30 : f32 to vector<16x13xf32>
    %91 = arith.select %89, %23, %90 : vector<16x13xi1>, vector<16x13xf32>
    %cst_31 = arith.constant dense<0.000000e+00> : vector<13xf32>
    %92 = vector.multi_reduction <add>, %91, %cst_31 [0] : vector<16x13xf32> to vector<13xf32>
    %93 = vector.shape_cast %92 : vector<13xf32> to vector<1x13xf32>
    %94 = vector.extract_strided_slice %17 {offsets = [7, 0], sizes = [1, 13], strides = [1, 1]} : vector<8x13xi32> to vector<1x13xi32>
    %95 = vector.broadcast %0 : i32 to vector<1x13xi32>
    %96 = arith.addi %94, %95 : vector<1x13xi32>
    %97 = vector.broadcast %96 : vector<1x13xi32> to vector<16x13xi32>
    %98 = arith.cmpi eq, %5, %97 : vector<16x13xi32>
    %cst_32 = arith.constant 0.000000e+00 : f32
    %99 = vector.broadcast %cst_32 : f32 to vector<16x13xf32>
    %100 = arith.select %98, %23, %99 : vector<16x13xi1>, vector<16x13xf32>
    %cst_33 = arith.constant dense<0.000000e+00> : vector<13xf32>
    %101 = vector.multi_reduction <add>, %100, %cst_33 [0] : vector<16x13xf32> to vector<13xf32>
    %102 = vector.shape_cast %101 : vector<13xf32> to vector<1x13xf32>
    %103 = arith.maximumf %39, %48 : vector<1x13xf32>
    %104 = arith.maximumf %103, %57 : vector<1x13xf32>
    %105 = arith.maximumf %104, %66 : vector<1x13xf32>
    %106 = arith.maximumf %105, %75 : vector<1x13xf32>
    %107 = arith.maximumf %106, %84 : vector<1x13xf32>
    %108 = arith.maximumf %107, %93 : vector<1x13xf32>
    %109 = arith.maximumf %108, %102 : vector<1x13xf32>
    %110 = arith.maximumf %30, %109 : vector<1x13xf32>
    %111 = arith.subf %30, %110 : vector<1x13xf32>
    %112 = math.exp %111 : vector<1x13xf32>
    %113 = arith.subf %39, %110 : vector<1x13xf32>
    %114 = math.exp %113 : vector<1x13xf32>
    %115 = arith.addf %112, %114 : vector<1x13xf32>
    %116 = arith.subf %48, %110 : vector<1x13xf32>
    %117 = math.exp %116 : vector<1x13xf32>
    %118 = arith.addf %115, %117 : vector<1x13xf32>
    %119 = arith.subf %57, %110 : vector<1x13xf32>
    %120 = math.exp %119 : vector<1x13xf32>
    %121 = arith.addf %118, %120 : vector<1x13xf32>
    %122 = arith.subf %66, %110 : vector<1x13xf32>
    %123 = math.exp %122 : vector<1x13xf32>
    %124 = arith.addf %121, %123 : vector<1x13xf32>
    %125 = arith.subf %75, %110 : vector<1x13xf32>
    %126 = math.exp %125 : vector<1x13xf32>
    %127 = arith.addf %124, %126 : vector<1x13xf32>
    %128 = arith.subf %84, %110 : vector<1x13xf32>
    %129 = math.exp %128 : vector<1x13xf32>
    %130 = arith.addf %127, %129 : vector<1x13xf32>
    %131 = arith.subf %93, %110 : vector<1x13xf32>
    %132 = math.exp %131 : vector<1x13xf32>
    %133 = arith.addf %130, %132 : vector<1x13xf32>
    %134 = arith.subf %102, %110 : vector<1x13xf32>
    %135 = math.exp %134 : vector<1x13xf32>
    %136 = arith.addf %133, %135 : vector<1x13xf32>
    %137 = math.log %136 : vector<1x13xf32>
    %138 = arith.addf %110, %137 : vector<1x13xf32>
    %139 = arith.subf %138, %30 : vector<1x13xf32>
    %140 = arith.cmpf oge, %30, %109 : vector<1x13xf32>
    %141 = arith.extui %140 : vector<1x13xi1> to vector<1x13xi32>
    %142 = arith.sitofp %141 : vector<1x13xi32> to vector<1x13xf32>
    %143 = vector.shape_cast %139 : vector<1x13xf32> to vector<1x1x13xf32>
    %cst_34 = arith.constant dense<0.000000e+00> : vector<1xf32>
    %144 = vector.multi_reduction <add>, %143, %cst_34 [1, 2] : vector<1x1x13xf32> to vector<1xf32>
    %145 = vector.shape_cast %144 : vector<1xf32> to vector<1x1x1xf32>
    %146 = vector.extract %145[0, 0, 0] : f32 from vector<1x1x1xf32>
    %147 = vector.broadcast %146 : f32 to vector<1x1xf32>
    %148 = arith.addf %7, %147 : vector<1x1xf32>
    %149 = vector.shape_cast %142 : vector<1x13xf32> to vector<1x1x13xf32>
    %cst_35 = arith.constant dense<0.000000e+00> : vector<1xf32>
    %150 = vector.multi_reduction <add>, %149, %cst_35 [1, 2] : vector<1x1x13xf32> to vector<1xf32>
    %151 = vector.shape_cast %150 : vector<1xf32> to vector<1x1x1xf32>
    %152 = vector.extract %151[0, 0, 0] : f32 from vector<1x1x1xf32>
    %153 = vector.broadcast %152 : f32 to vector<1x1xf32>
    %154 = arith.addf %8, %153 : vector<1x1xf32>
    %c1_i32_36 = arith.constant 1 : i32
    %155 = arith.index_cast %c1_i32_36 : i32 to index
    %c0_37 = arith.constant 0 : index
    %c0_38 = arith.constant 0 : index
    %156 = vector.load %arg3[%155, %c0_37, %c0_38] : memref<2x13x32xf32, #tpu.memory_space<vmem>>, vector<1x13x32xf32>
    %157 = vector.shape_cast %156 : vector<1x13x32xf32> to vector<13x32xf32>
    %158 = arith.index_cast %c1_i32_36 : i32 to index
    %c0_39 = arith.constant 0 : index
    %c0_40 = arith.constant 0 : index
    %159 = vector.load %arg2[%158, %c0_39, %c0_40] : memref<2x16x32xf32, #tpu.memory_space<vmem>>, vector<1x16x32xf32>
    %160 = vector.shape_cast %159 : vector<1x16x32xf32> to vector<16x32xf32>
    %c0_41 = arith.constant 0 : index
    %161 = arith.index_cast %c1_i32_36 : i32 to index
    %c0_42 = arith.constant 0 : index
    %c0_43 = arith.constant 0 : index
    %162 = vector.load %arg6[%c0_41, %161, %c0_42, %c0_43] : memref<1x2x8x13xi32, #tpu.memory_space<vmem>>, vector<1x1x8x13xi32>
    %163 = vector.shape_cast %162 : vector<1x1x8x13xi32> to vector<8x13xi32>
    %cst_44 = arith.constant dense<0.000000e+00> : vector<32x13xf32>
    %164 = tpu.matmul %2, %157, %cst_44 {dimension_numbers = #tpu.dot_dimension_numbers<[1], [1], [0], [0], [0, 0, 1, 0], [], []>, precision = #tpu.contract_precision<fp32>} : vector<32x32xf32>, vector<13x32xf32>, vector<32x13xf32> -> vector<32x13xf32>
    %165 = vector.broadcast %4 : vector<32x1xf32> to vector<32x13xf32>
    %166 = arith.addf %164, %165 : vector<32x13xf32>
    %cst_45 = arith.constant 0.176776692 : f32
    %167 = vector.broadcast %cst_45 : f32 to vector<32x13xf32>
    %168 = arith.mulf %166, %167 : vector<32x13xf32>
    %cst_46 = arith.constant dense<0.000000e+00> : vector<16x13xf32>
    %169 = tpu.matmul %160, %168, %cst_46 {dimension_numbers = #tpu.dot_dimension_numbers<[1], [0], [0], [1], [0, 0, 1, 1], [], []>, precision = #tpu.contract_precision<fp32>} : vector<16x32xf32>, vector<32x13xf32>, vector<16x13xf32> -> vector<16x13xf32>
    %170 = vector.broadcast %0 : i32 to vector<16x13xi32>
    %171 = arith.addi %6, %170 : vector<16x13xi32>
    %172 = arith.cmpi eq, %5, %171 : vector<16x13xi32>
    %cst_47 = arith.constant 0.000000e+00 : f32
    %173 = vector.broadcast %cst_47 : f32 to vector<16x13xf32>
    %174 = arith.select %172, %169, %173 : vector<16x13xi1>, vector<16x13xf32>
    %cst_48 = arith.constant dense<0.000000e+00> : vector<13xf32>
    %175 = vector.multi_reduction <add>, %174, %cst_48 [0] : vector<16x13xf32> to vector<13xf32>
    %176 = vector.shape_cast %175 : vector<13xf32> to vector<1x13xf32>
    %177 = vector.extract_strided_slice %163 {offsets = [0, 0], sizes = [1, 13], strides = [1, 1]} : vector<8x13xi32> to vector<1x13xi32>
    %178 = vector.broadcast %0 : i32 to vector<1x13xi32>
    %179 = arith.addi %177, %178 : vector<1x13xi32>
    %180 = vector.broadcast %179 : vector<1x13xi32> to vector<16x13xi32>
    %181 = arith.cmpi eq, %5, %180 : vector<16x13xi32>
    %cst_49 = arith.constant 0.000000e+00 : f32
    %182 = vector.broadcast %cst_49 : f32 to vector<16x13xf32>
    %183 = arith.select %181, %169, %182 : vector<16x13xi1>, vector<16x13xf32>
    %cst_50 = arith.constant dense<0.000000e+00> : vector<13xf32>
    %184 = vector.multi_reduction <add>, %183, %cst_50 [0] : vector<16x13xf32> to vector<13xf32>
    %185 = vector.shape_cast %184 : vector<13xf32> to vector<1x13xf32>
    %186 = vector.extract_strided_slice %163 {offsets = [1, 0], sizes = [1, 13], strides = [1, 1]} : vector<8x13xi32> to vector<1x13xi32>
    %187 = vector.broadcast %0 : i32 to vector<1x13xi32>
    %188 = arith.addi %186, %187 : vector<1x13xi32>
    %189 = vector.broadcast %188 : vector<1x13xi32> to vector<16x13xi32>
    %190 = arith.cmpi eq, %5, %189 : vector<16x13xi32>
    %cst_51 = arith.constant 0.000000e+00 : f32
    %191 = vector.broadcast %cst_51 : f32 to vector<16x13xf32>
    %192 = arith.select %190, %169, %191 : vector<16x13xi1>, vector<16x13xf32>
    %cst_52 = arith.constant dense<0.000000e+00> : vector<13xf32>
    %193 = vector.multi_reduction <add>, %192, %cst_52 [0] : vector<16x13xf32> to vector<13xf32>
    %194 = vector.shape_cast %193 : vector<13xf32> to vector<1x13xf32>
    %195 = vector.extract_strided_slice %163 {offsets = [2, 0], sizes = [1, 13], strides = [1, 1]} : vector<8x13xi32> to vector<1x13xi32>
    %196 = vector.broadcast %0 : i32 to vector<1x13xi32>
    %197 = arith.addi %195, %196 : vector<1x13xi32>
    %198 = vector.broadcast %197 : vector<1x13xi32> to vector<16x13xi32>
    %199 = arith.cmpi eq, %5, %198 : vector<16x13xi32>
    %cst_53 = arith.constant 0.000000e+00 : f32
    %200 = vector.broadcast %cst_53 : f32 to vector<16x13xf32>
    %201 = arith.select %199, %169, %200 : vector<16x13xi1>, vector<16x13xf32>
    %cst_54 = arith.constant dense<0.000000e+00> : vector<13xf32>
    %202 = vector.multi_reduction <add>, %201, %cst_54 [0] : vector<16x13xf32> to vector<13xf32>
    %203 = vector.shape_cast %202 : vector<13xf32> to vector<1x13xf32>
    %204 = vector.extract_strided_slice %163 {offsets = [3, 0], sizes = [1, 13], strides = [1, 1]} : vector<8x13xi32> to vector<1x13xi32>
    %205 = vector.broadcast %0 : i32 to vector<1x13xi32>
    %206 = arith.addi %204, %205 : vector<1x13xi32>
    %207 = vector.broadcast %206 : vector<1x13xi32> to vector<16x13xi32>
    %208 = arith.cmpi eq, %5, %207 : vector<16x13xi32>
    %cst_55 = arith.constant 0.000000e+00 : f32
    %209 = vector.broadcast %cst_55 : f32 to vector<16x13xf32>
    %210 = arith.select %208, %169, %209 : vector<16x13xi1>, vector<16x13xf32>
    %cst_56 = arith.constant dense<0.000000e+00> : vector<13xf32>
    %211 = vector.multi_reduction <add>, %210, %cst_56 [0] : vector<16x13xf32> to vector<13xf32>
    %212 = vector.shape_cast %211 : vector<13xf32> to vector<1x13xf32>
    %213 = vector.extract_strided_slice %163 {offsets = [4, 0], sizes = [1, 13], strides = [1, 1]} : vector<8x13xi32> to vector<1x13xi32>
    %214 = vector.broadcast %0 : i32 to vector<1x13xi32>
    %215 = arith.addi %213, %214 : vector<1x13xi32>
    %216 = vector.broadcast %215 : vector<1x13xi32> to vector<16x13xi32>
    %217 = arith.cmpi eq, %5, %216 : vector<16x13xi32>
    %cst_57 = arith.constant 0.000000e+00 : f32
    %218 = vector.broadcast %cst_57 : f32 to vector<16x13xf32>
    %219 = arith.select %217, %169, %218 : vector<16x13xi1>, vector<16x13xf32>
    %cst_58 = arith.constant dense<0.000000e+00> : vector<13xf32>
    %220 = vector.multi_reduction <add>, %219, %cst_58 [0] : vector<16x13xf32> to vector<13xf32>
    %221 = vector.shape_cast %220 : vector<13xf32> to vector<1x13xf32>
    %222 = vector.extract_strided_slice %163 {offsets = [5, 0], sizes = [1, 13], strides = [1, 1]} : vector<8x13xi32> to vector<1x13xi32>
    %223 = vector.broadcast %0 : i32 to vector<1x13xi32>
    %224 = arith.addi %222, %223 : vector<1x13xi32>
    %225 = vector.broadcast %224 : vector<1x13xi32> to vector<16x13xi32>
    %226 = arith.cmpi eq, %5, %225 : vector<16x13xi32>
    %cst_59 = arith.constant 0.000000e+00 : f32
    %227 = vector.broadcast %cst_59 : f32 to vector<16x13xf32>
    %228 = arith.select %226, %169, %227 : vector<16x13xi1>, vector<16x13xf32>
    %cst_60 = arith.constant dense<0.000000e+00> : vector<13xf32>
    %229 = vector.multi_reduction <add>, %228, %cst_60 [0] : vector<16x13xf32> to vector<13xf32>
    %230 = vector.shape_cast %229 : vector<13xf32> to vector<1x13xf32>
    %231 = vector.extract_strided_slice %163 {offsets = [6, 0], sizes = [1, 13], strides = [1, 1]} : vector<8x13xi32> to vector<1x13xi32>
    %232 = vector.broadcast %0 : i32 to vector<1x13xi32>
    %233 = arith.addi %231, %232 : vector<1x13xi32>
    %234 = vector.broadcast %233 : vector<1x13xi32> to vector<16x13xi32>
    %235 = arith.cmpi eq, %5, %234 : vector<16x13xi32>
    %cst_61 = arith.constant 0.000000e+00 : f32
    %236 = vector.broadcast %cst_61 : f32 to vector<16x13xf32>
    %237 = arith.select %235, %169, %236 : vector<16x13xi1>, vector<16x13xf32>
    %cst_62 = arith.constant dense<0.000000e+00> : vector<13xf32>
    %238 = vector.multi_reduction <add>, %237, %cst_62 [0] : vector<16x13xf32> to vector<13xf32>
    %239 = vector.shape_cast %238 : vector<13xf32> to vector<1x13xf32>
    %240 = vector.extract_strided_slice %163 {offsets = [7, 0], sizes = [1, 13], strides = [1, 1]} : vector<8x13xi32> to vector<1x13xi32>
    %241 = vector.broadcast %0 : i32 to vector<1x13xi32>
    %242 = arith.addi %240, %241 : vector<1x13xi32>
    %243 = vector.broadcast %242 : vector<1x13xi32> to vector<16x13xi32>
    %244 = arith.cmpi eq, %5, %243 : vector<16x13xi32>
    %cst_63 = arith.constant 0.000000e+00 : f32
    %245 = vector.broadcast %cst_63 : f32 to vector<16x13xf32>
    %246 = arith.select %244, %169, %245 : vector<16x13xi1>, vector<16x13xf32>
    %cst_64 = arith.constant dense<0.000000e+00> : vector<13xf32>
    %247 = vector.multi_reduction <add>, %246, %cst_64 [0] : vector<16x13xf32> to vector<13xf32>
    %248 = vector.shape_cast %247 : vector<13xf32> to vector<1x13xf32>
    %249 = arith.maximumf %185, %194 : vector<1x13xf32>
    %250 = arith.maximumf %249, %203 : vector<1x13xf32>
    %251 = arith.maximumf %250, %212 : vector<1x13xf32>
    %252 = arith.maximumf %251, %221 : vector<1x13xf32>
    %253 = arith.maximumf %252, %230 : vector<1x13xf32>
    %254 = arith.maximumf %253, %239 : vector<1x13xf32>
    %255 = arith.maximumf %254, %248 : vector<1x13xf32>
    %256 = arith.maximumf %176, %255 : vector<1x13xf32>
    %257 = arith.subf %176, %256 : vector<1x13xf32>
    %258 = math.exp %257 : vector<1x13xf32>
    %259 = arith.subf %185, %256 : vector<1x13xf32>
    %260 = math.exp %259 : vector<1x13xf32>
    %261 = arith.addf %258, %260 : vector<1x13xf32>
    %262 = arith.subf %194, %256 : vector<1x13xf32>
    %263 = math.exp %262 : vector<1x13xf32>
    %264 = arith.addf %261, %263 : vector<1x13xf32>
    %265 = arith.subf %203, %256 : vector<1x13xf32>
    %266 = math.exp %265 : vector<1x13xf32>
    %267 = arith.addf %264, %266 : vector<1x13xf32>
    %268 = arith.subf %212, %256 : vector<1x13xf32>
    %269 = math.exp %268 : vector<1x13xf32>
    %270 = arith.addf %267, %269 : vector<1x13xf32>
    %271 = arith.subf %221, %256 : vector<1x13xf32>
    %272 = math.exp %271 : vector<1x13xf32>
    %273 = arith.addf %270, %272 : vector<1x13xf32>
    %274 = arith.subf %230, %256 : vector<1x13xf32>
    %275 = math.exp %274 : vector<1x13xf32>
    %276 = arith.addf %273, %275 : vector<1x13xf32>
    %277 = arith.subf %239, %256 : vector<1x13xf32>
    %278 = math.exp %277 : vector<1x13xf32>
    %279 = arith.addf %276, %278 : vector<1x13xf32>
    %280 = arith.subf %248, %256 : vector<1x13xf32>
    %281 = math.exp %280 : vector<1x13xf32>
    %282 = arith.addf %279, %281 : vector<1x13xf32>
    %283 = math.log %282 : vector<1x13xf32>
    %284 = arith.addf %256, %283 : vector<1x13xf32>
    %285 = arith.subf %284, %176 : vector<1x13xf32>
    %286 = arith.cmpf oge, %176, %255 : vector<1x13xf32>
    %287 = arith.extui %286 : vector<1x13xi1> to vector<1x13xi32>
    %288 = arith.sitofp %287 : vector<1x13xi32> to vector<1x13xf32>
    %289 = vector.shape_cast %285 : vector<1x13xf32> to vector<1x1x13xf32>
    %cst_65 = arith.constant dense<0.000000e+00> : vector<1xf32>
    %290 = vector.multi_reduction <add>, %289, %cst_65 [1, 2] : vector<1x1x13xf32> to vector<1xf32>
    %291 = vector.shape_cast %290 : vector<1xf32> to vector<1x1x1xf32>
    %292 = vector.extract %291[0, 0, 0] : f32 from vector<1x1x1xf32>
    %293 = vector.broadcast %292 : f32 to vector<1x1xf32>
    %294 = arith.addf %148, %293 : vector<1x1xf32>
    %295 = vector.shape_cast %288 : vector<1x13xf32> to vector<1x1x13xf32>
    %cst_66 = arith.constant dense<0.000000e+00> : vector<1xf32>
    %296 = vector.multi_reduction <add>, %295, %cst_66 [1, 2] : vector<1x1x13xf32> to vector<1xf32>
    %297 = vector.shape_cast %296 : vector<1xf32> to vector<1x1x1xf32>
    %298 = vector.extract %297[0, 0, 0] : f32 from vector<1x1x1xf32>
    %299 = vector.broadcast %298 : f32 to vector<1x1xf32>
    %300 = arith.addf %154, %299 : vector<1x1xf32>
    %c2_i32 = arith.constant 2 : i32
    %301 = tpu.iota {dimensions = array<i32: 0>} : vector<8x128xi32>
    %c0_i32_67 = arith.constant 0 : i32
    %302 = vector.broadcast %c0_i32_67 : i32 to vector<8x128xi32>
    %303 = arith.cmpi eq, %301, %302 : vector<8x128xi32>
    %c1_i32_68 = arith.constant 1 : i32
    %304 = vector.broadcast %c1_i32_68 : i32 to vector<8x128xi32>
    %305 = arith.cmpi eq, %301, %304 : vector<8x128xi32>
    %cst_69 = arith.constant 0.000000e+00 : f32
    %306 = vector.shape_cast %300 : vector<1x1xf32> to vector<1x1xf32>
    %307 = vector.broadcast %306 : vector<1x1xf32> to vector<8x128xf32>
    %308 = vector.broadcast %cst_69 : f32 to vector<8x128xf32>
    %309 = arith.select %305, %307, %308 : vector<8x128xi1>, vector<8x128xf32>
    %310 = vector.shape_cast %294 : vector<1x1xf32> to vector<1x1xf32>
    %311 = vector.broadcast %310 : vector<1x1xf32> to vector<8x128xf32>
    %312 = arith.select %303, %311, %309 : vector<8x128xi1>, vector<8x128xf32>
    %c0_70 = arith.constant 0 : index
    %c0_71 = arith.constant 0 : index
    %c0_72 = arith.constant 0 : index
    %c0_73 = arith.constant 0 : index
    %313 = vector.load %arg7[%c0_70, %c0_71, %c0_72, %c0_73] : memref<1x1x8x128xf32, #tpu.memory_space<vmem>>, vector<1x1x8x128xf32>
    %314 = vector.shape_cast %313 : vector<1x1x8x128xf32> to vector<8x128xf32>
    %315 = vector.shape_cast %312 : vector<8x128xf32> to vector<1x1x8x128xf32>
    tpu.vector_store %arg7[%c0_70, %c0_71, %c0_72, %c0_73], %315 {strides = array<i32>} : memref<1x1x8x128xf32, #tpu.memory_space<vmem>>, vector<1x1x8x128xf32>,
    return
  }
  func.func @transform_0(%arg0: i32, %arg1: i32) -> (i32, i32, i32) {
    %c0_i32 = arith.constant 0 : i32
    %c0_i32_0 = arith.constant 0 : i32
    %c0_i32_1 = arith.constant 0 : i32
    return %arg0, %c0_i32, %c0_i32_0 : i32, i32, i32
  }
  func.func @transform_1(%arg0: i32, %arg1: i32) -> (i32, i32, i32) {
    %c0_i32 = arith.constant 0 : i32
    %c0_i32_0 = arith.constant 0 : i32
    %c0_i32_1 = arith.constant 0 : i32
    return %arg0, %c0_i32, %c0_i32_0 : i32, i32, i32
  }
  func.func @transform_2(%arg0: i32, %arg1: i32) -> (i32, i32, i32) {
    %c0_i32 = arith.constant 0 : i32
    %c0_i32_0 = arith.constant 0 : i32
    %c0_i32_1 = arith.constant 0 : i32
    return %arg1, %c0_i32, %c0_i32_0 : i32, i32, i32
  }
  func.func @transform_3(%arg0: i32, %arg1: i32) -> (i32, i32, i32) {
    %c0_i32 = arith.constant 0 : i32
    %c0_i32_0 = arith.constant 0 : i32
    %c0_i32_1 = arith.constant 0 : i32
    return %arg1, %c0_i32, %c0_i32_0 : i32, i32, i32
  }
  func.func @transform_4(%arg0: i32, %arg1: i32) -> (i32, i32, i32, i32) {
    %c0_i32 = arith.constant 0 : i32
    %c0_i32_0 = arith.constant 0 : i32
    %c0_i32_1 = arith.constant 0 : i32
    return %arg1, %arg0, %c0_i32, %c0_i32_0 : i32, i32, i32, i32
  }
  func.func @transform_5(%arg0: i32, %arg1: i32) -> (i32, i32, i32, i32) {
    %c0_i32 = arith.constant 0 : i32
    %c0_i32_0 = arith.constant 0 : i32
    %c0_i32_1 = arith.constant 0 : i32
    return %arg0, %arg1, %c0_i32, %c0_i32_0 : i32, i32, i32, i32
  }
}

</mosaic_0001>

<bundles_post_ra>
// kernel: cpc_loss_same_seq.1
= control target key start
LH: loop header
LB: loop body
LE: loop exit
PB: predicated region body
PF: predicated region fallthrough
CT: control target
= control target key end

     0   :  { %s5262_s0 = inlined_call_operand.hbm [shape: f32[4,16,32], index: 0, kind: input, shape index: {}]   ;;  %s5263_s1 = inlined_call_operand.hbm [shape: f32[4,13,32], index: 1, kind: input, shape index: {}]   ;;  %s5264_s2 = inlined_call_operand.vmem [shape: f32[3,32,32], index: 2, kind: input, shape index: {}]   ;;  %s5265_s3 = inlined_call_operand.vmem [shape: f32[3,32,1], index: 3, kind: input, shape index: {}]   ;;  %s5266_s4 = inlined_call_operand.hbm [shape: s32[3,4,8,13], index: 4, kind: input, shape index: {}]   ;;  %s5267_s5 = inlined_call_operand.vmem [shape: f32[2,3,8,128], index: 5, kind: output, shape index: {}]  }
   0x1   :  { %5283 = sst [smem:[#allocation14_spill]] %s5262_s0 }
   0x2   :  { %5284 = sst [smem:[#allocation15_spill]] %s5263_s1 }
   0x3   :  { %5285 = sst [smem:[#allocation16_spill]] %s5264_s2 }
   0x4   :  { %5286 = sst [smem:[#allocation17_spill]] %s5265_s3 }
   0x5   :  { %5287 = sst [smem:[#allocation18_spill]] %s5267_s5 }
   0x6   :  { %10 = vsyncpa [#allocation3], 0 }
   0x7   :  { %12 = vsyncpa [#allocation3 + $0x1], 0 }
   0x8   :  { %13 = vsyncpa [#allocation5], 0 }
   0x9   :  { %15 = vsyncpa [#allocation5 + $0x1], 0  ;;  %s4367_s18 = smov 0   ;;  %s4369_s19 = smov 0  }
   0xa   :  { %s4371_s20 = smov 0   ;;  %s4373_s21 = smov 0  }
   0xb   :  { %s4375_s22 = smov 0   ;;  %s4377_s23 = smov 0  }
   0xc   :  { %s4379_s24 = smov 0   ;;  %s4381_s25 = smov 0  }
   0xd   :  { %s4383_s26 = smov 0   ;;  %s4385_s27 = smov 0  }
   0xe   :  { %s4387_s28 = smov 0  }
   0xf LB: > { %5288 = sst [smem:[#allocation10_spill]] %s4312_s24  ;;  %s5268_s29 = sadd.s32 4294967295, %s4328_s28   ;;  %s4328_s28 = sphi %s4387_s28, %s21_s28   ;;  %s4324_s27 = sphi %s4385_s27, %s5333_s27   ;;  %s4320_s26 = sphi %s4383_s26, %s5332_s26   ;;  %s4316_s25 = sphi %s4381_s25, %s5331_s25   ;;  %s4312_s24 = sphi %s4379_s24, %s5330_s24   ;;  %s4308_s23 = sphi %s4377_s23, %s5329_s23   ;;  %s4304_s22 = sphi %s4375_s22, %s5328_s22   ;;  %s4300_s21 = sphi %s4373_s21, %s5327_s21   ;;  %s4296_s20 = sphi %s4371_s20, %s5326_s20   ;;  %s4292_s19 = sphi %s4369_s19, %s5325_s19   ;;  %s4288_s18 = sphi %s4367_s18, %s5324_s18  }
  0x10   : > { %5289 = sst [smem:[#allocation11_spill]] %s4316_s25  ;;  %p47_p0 = scmp.ne.s32.totalorder %s4308_s23, %s4304_s22 }
  0x11   : > { %p5271_p1 = scmp.eq.s32.totalorder %s4328_s28, 0  ;;  %p53_p2 = scmp.ne.s32.totalorder %s4304_s22, %s4300_s21 }
  0x12   : > { %p4429_p3 = scmp.eq.s32.totalorder %s5268_s29, 0  ;;  %p5270_p5 = scmp.lt.s32.totalorder %s4328_s28, 6 }
  0x13   : > { %p49_p4 = por %p5271_p1, %p47_p0  ;;  %s5269_s9 = sand.u32 1, %s4308_s23  }
  0x14   : > { %p4438_p6 = por %p4429_p3, %p53_p2  ;;  %s4445_s10 = sshll.u32 %s5269_s9, 5 }
  0x15   : > { %s3367_s11 = sshll.u32 %s4324_s27, 9  ;;  %p4450_p7 = pnand %p5270_p5, %p49_p4 }
  0x16   : > { %s5291_s8 = scalar_select %p4438_p6, 1, 0 }
  0x17   : > { %s233_s13 = sand.u32 1, %s4328_s28   ;;  %s5293_s1 = sld [smem:[#allocation15_spill]] }
  0x18   : > { %s237_s17 = scalar_lea.vmem [#allocation4], %s4445_s10  ;;  %s4467_s29 = scalar_lea.sflag [#allocation5], %s233_s13 }
  0x19   : > { %s245_s21 = sshll.u32 %s237_s17, 4  ;;  %p4142_p11 = pneg %p4450_p7  ;;  %s4464_s21 = int_to_ptr.vmem [resolvable:$true] %s245_s21 }
  0x1d   : > { %s4460_s16 = scalar_lea.hbm %s5293_s1, %s3367_s11  ;;  %s4145_s30 = scalar_lea.hbm %s5293_s1, 1024 }
  0x1e   : > { %s4140_s6 = scalar_lea.hbm %s4460_s16, 512  ;;  %p4146_p0 = scmp.lt.u32.totalorder %s4460_s16, %s5293_s1 }
  0x1f   : > { %p4141_p10 = scmp.ne.s32.totalorder %s4460_s16, %s4140_s6  ;;  %p4147_p2 = scmp.lt.u32.totalorder %s4145_s30, %s4140_s6 }
  0x20   : > { %p4149_p5 = scmp.lt.u32.totalorder %s4140_s6, %s4460_s16 }
  0x21   : > { %p4143_p12 = pnand %p4142_p11, %p4141_p10  ;;  %p4148_p4 = por %p4147_p2, %p4146_p0 }
  0x23   : > { %p4144_p13 = pneg %p4143_p12  ;;  %p4150_p1 = por %p4149_p5, %p4148_p4 }
  0x25   : > { %p4151_p8 = pnand %p4150_p1, %p4144_p13 }
  0x27   : > { %4154 = shalt.err (!%p4151_p8)
}
  0x28   : > { %s4155_s13 = scalar_lea.vmem %s4464_s21, 512  ;;  %s4330_s14 = smov [#allocation4]  }
  0x29   : > { %p4156_p10 = scmp.ne.s32.totalorder %s4464_s21, %s4155_s13  ;;  %s4160_s15 = sshll.u32 %s4330_s14, 4  ;;  %s4161_s15 = int_to_ptr.vmem [resolvable:$false] %s4160_s15 }
  0x2a   : > { %s4162_s9 = scalar_lea.vmem %s4161_s15, 1024  ;;  %p4163_p6 = scmp.lt.s32.totalorder %s4464_s21, %s4161_s15 }
  0x2b   : > { %p4158_p12 = pnand %p4156_p10, %p4142_p11  ;;  %p4164_p0 = scmp.lt.s32.totalorder %s4162_s9, %s4155_s13 }
  0x2d   : > { %p4159_p9 = pneg %p4158_p12  ;;  %p4165_p2 = por %p4164_p0, %p4163_p6 }
  0x2f   : > { %p4166_p5 = pnand %p4165_p2, %p4159_p9 }
  0x31   : > { %4169 = shalt.err (!%p4166_p5)
}
  0x32   : > { %s5273_s30 = smov 128   ;;  %s5275_s6 = smov 8  }
  0x33   : > { %4001 = dma.hbm_to_vmem [thread:$0]  (!%p4450_p7), %s4460_s16, 512, %s4464_s21, %s4467_s29, %s5273_s30, %s5273_s30, %s5275_s6  }
  0x34   : > { %p5294_p1 = scmp.lt.s32.totalorder %s4328_s28, 7  ;;  %p5295_p6 = scmp.ge.s32.totalorder %s4328_s28, 1 }
  0x35   : > { %s5297_s0 = sld [smem:[#allocation14_spill]]  ;;  %s215_s9 = scalar_lea.vmem [#allocation2], %s4445_s10 }
  0x36   : > { %p4502_p8 = pnand %p5295_p6, %p5294_p1  ;;  %s223_s1 = sshll.u32 %s215_s9, 4  ;;  %s4514_s1 = int_to_ptr.vmem [resolvable:$true] %s223_s1 }
  0x37   : > { %s5298_s16 = sand.u32 1, %s4308_s23  }
  0x38   : > { %s5296_s17 = scalar_select %p4502_p8, 1, 0 }
  0x39   : > { %s4518_s21 = scalar_lea.sflag [#allocation3], %s5298_s16 }
  0x3b   : > { %s4511_s15 = scalar_lea.hbm %s5297_s0, %s3367_s11  ;;  %s4175_s14 = scalar_lea.hbm %s5297_s0, 1024 }
  0x3c   : > { %s4170_s30 = scalar_lea.hbm %s4511_s15, 512  ;;  %p4176_p10 = scmp.lt.u32.totalorder %s4511_s15, %s5297_s0 }
  0x3d   : > { %p4171_p9 = scmp.ne.s32.totalorder %s4511_s15, %s4170_s30  ;;  %p4177_p12 = scmp.lt.u32.totalorder %s4175_s14, %s4170_s30 }
  0x3e   : > { %p4179_p2 = scmp.lt.u32.totalorder %s4170_s30, %s4511_s15 }
  0x3f   : > { %p4173_p13 = pnand %p4171_p9, %p4142_p11  ;;  %p4178_p0 = por %p4177_p12, %p4176_p10 }
  0x41   : > { %p4174_p4 = pneg %p4173_p13  ;;  %p4180_p5 = por %p4179_p2, %p4178_p0 }
  0x43   : > { %p4181_p1 = pnand %p4180_p5, %p4174_p4 }
  0x45   : > { %4184 = shalt.err (!%p4181_p1)
}
  0x46   : > { %s4185_s10 = scalar_lea.vmem %s4514_s1, 512  ;;  %s4333_s9 = smov [#allocation2]  }
  0x47   : > { %p4186_p6 = scmp.ne.s32.totalorder %s4514_s1, %s4185_s10  ;;  %s4190_s16 = sshll.u32 %s4333_s9, 4  ;;  %s4191_s16 = int_to_ptr.vmem [resolvable:$false] %s4190_s16 }
  0x48   : > { %s4192_s5 = scalar_lea.vmem %s4191_s16, 1024  ;;  %p4193_p8 = scmp.lt.s32.totalorder %s4514_s1, %s4191_s16 }
  0x49   : > { %p4188_p9 = pnand %p4186_p6, %p4142_p11  ;;  %p4194_p10 = scmp.lt.s32.totalorder %s4192_s5, %s4185_s10 }
  0x4b   : > { %p4189_p13 = pneg %p4188_p9  ;;  %p4195_p12 = por %p4194_p10, %p4193_p8 }
  0x4d   : > { %p4196_p0 = pnand %p4195_p12, %p4189_p13 }
  0x4f   : > { %4199 = shalt.err (!%p4196_p0)
}
  0x50   : > { %s5299_s30 = smov 8   ;;  %s5300_s6 = smov 128  }
  0x51   : > { %3998 = dma.hbm_to_vmem [thread:$0]  (!%p4450_p7), %s4511_s15, 512, %s4514_s1, %s4518_s21, %s5300_s6, %s5300_s6, %s5299_s30  }
  0x52   : > { %s30_s12 = sadd.s32 1, %s4320_s26  ;;  %s146_s13 = sadd.s32 1, %s4296_s20 }
  0x53   : > { %p31_p11 = scmp.ge.s32.totalorder %s30_s12, 3  ;;  %p153_p8 = scmp.ne.s32.totalorder %s4296_s20, %s4292_s19 }
  0x54   : > { %p159_p4 = scmp.ne.s32.totalorder %s4292_s19, %s4288_s18  ;;  %s273_s11 = sand.u32 1, %s4296_s20  }
  0x55   : > { %s5335_s12 = smov (%p31_p11, %s30_s12), 0  ;;  %s5302_s14 = sadd.s32 1, %s4324_s27 }
  0x56   : > { %5301 = sst [smem:[#allocation12_spill]] %s5335_s12  ;;  %s5337_s14 = smov (!%p31_p11, %s5302_s14), %s4324_s27 }
  0x57   : > { %s141_s10 = ssub.s32 %s4320_s26, %s5335_s12  ;;  %p5303_p2 = scmp.eq.s32.totalorder %s4328_s28, 0 }
  0x58   : > { %p35_p7 = scmp.ge.s32.totalorder %s5337_s14, 2  ;;  %p4569_p1 = por %p159_p4, %p4429_p3 }
  0x59   : > { %p4563_p5 = por %p153_p8, %p5303_p2  ;;  %s3344_s18 = sshll.u32 %s273_s11, 4 }
  0x5a   : > { %s3345_s21 = sshll.u32 %s4324_s27, 1  ;;  %s5339_s14 = smov (%p35_p7, %s5337_s14), 0 }
  0x5b   : > { %5306 = sst [smem:[#allocation13_spill]] %s5339_s14  ;;  %s3346_s9 = sshll.u32 %s4320_s26, 2 }
  0x5c   : > { %s37_s16 = ssub.s32 %s4324_s27, %s5339_s14  ;;  %s281_s5 = sadd.s32 %s3346_s9, %s3345_s21 }
  0x5d   : > { %p38_p6 = scmp.eq.s32.totalorder %s37_s16, 0  ;;  %s143_s0 = sor.u32 %s141_s10, %s37_s16 }
  0x5e   : > { %p144_p9 = scmp.eq.s32.totalorder %s143_s0, 0  ;;  %s3347_s12 = sshll.u32 %s281_s5, 7 }
  0x5f   : > { %s5307_s25 = sadd.s32 1, %s4308_s23  ;;  %s4590_s24 = scalar_lea.hbm %s5266_s4, %s3347_s12 }
  0x60   : > { %s4582_s7 = scalar_select %p38_p6, %s4308_s23, %s5307_s25  }
  0x61   : > { %s4585_s3 = scalar_select %p144_p9, %s4296_s20, %s146_s13  }
  0x62   : > { %s275_s14 = scalar_lea.vmem [#allocation6], %s3344_s18  ;;  %p5308_p3 = scmp.lt.s32.totalorder %s4328_s28, 6 }
  0x63   : > { %s284_s21 = sshll.u32 %s275_s14, 4  ;;  %s4200_s25 = scalar_lea.hbm %s4590_s24, 256  ;;  %s4592_s21 = int_to_ptr.vmem [resolvable:$true] %s284_s21 }
  0x64   : > { %p4598_p13 = pnand %p5308_p3, %p4563_p5  ;;  %p4201_p10 = scmp.ne.s32.totalorder %s4590_s24, %s4200_s25 }
  0x65   : > { %s4205_s13 = scalar_lea.hbm %s5266_s4, 1536  ;;  %p4206_p8 = scmp.lt.u32.totalorder %s4590_s24, %s5266_s4 }
  0x66   : > { %p4202_p12 = pneg %p4598_p13  ;;  %p4207_p4 = scmp.lt.u32.totalorder %s4205_s13, %s4200_s25 }
  0x67   : > { %p4209_p5 = scmp.lt.u32.totalorder %s4200_s25, %s4590_s24 }
  0x68   : > { %p4203_p0 = pnand %p4202_p12, %p4201_p10  ;;  %p4208_p2 = por %p4207_p4, %p4206_p8 }
  0x6a   : > { %p4204_p11 = pneg %p4203_p0  ;;  %p4210_p7 = por %p4209_p5, %p4208_p2 }
  0x6c   : > { %p4211_p6 = pnand %p4210_p7, %p4204_p11 }
  0x6e   : > { %4214 = shalt.err (!%p4211_p6)
}
  0x6f   : > { %s4215_s1 = scalar_lea.vmem %s4592_s21, 256  ;;  %s4334_s18 = smov [#allocation6]  }
  0x70   : > { %p4216_p9 = scmp.ne.s32.totalorder %s4592_s21, %s4215_s1  ;;  %s4220_s9 = sshll.u32 %s4334_s18, 4  ;;  %s4221_s9 = int_to_ptr.vmem [resolvable:$false] %s4220_s9 }
  0x71   : > { %s4222_s16 = scalar_lea.vmem %s4221_s9, 512  ;;  %p4223_p0 = scmp.lt.s32.totalorder %s4592_s21, %s4221_s9 }
  0x72   : > { %p4218_p3 = pnand %p4216_p9, %p4202_p12  ;;  %p4224_p8 = scmp.lt.s32.totalorder %s4222_s16, %s4215_s1 }
  0x74   : > { %p4219_p10 = pneg %p4218_p3  ;;  %p4225_p4 = por %p4224_p8, %p4223_p0 }
  0x76   : > { %p4226_p2 = pnand %p4225_p4, %p4219_p10 }
  0x78   : > { %4229 = shalt.err (!%p4226_p2)
}
  0x79   : > { %4004 = dma.hbm_to_vmem [thread:$0]  (!%p4598_p13), %s4590_s24, 256, %s4592_s21, %s4467_s29, %s5300_s6, %s5300_s6, %s5299_s30  }
  0x7a   : > { %p5310_p12 = scmp.ne.s32.totalorder %s5296_s17, 0 }
  0x7b   : > { %s298_s5 = sand.u32 (!%p5310_p12), 1, %s4304_s22   ;;  %p5311_p11 = scmp.ne.s32.totalorder (!%p5310_p12), %s5291_s8, 0 }
  0x7c   : > { %296 = sbr.rel (%p5310_p12) target bundleno = 1039 (0x40f), region = 40  ;;  %s3349_s11 = sshll.u32 (!%p5310_p12), %s298_s5, 5 }
  0x7d   : > { %s299_s25 = scalar_lea.sflag (!%p5310_p12), [#allocation3], %s298_s5  ;;  %s4634_s2 = scalar_lea.vmem (!%p5310_p12), [#allocation2], %s3349_s11 }
  0x83   : > { %4275 = dma.done.wait (%p5311_p11), %s299_s25, 512  }
  0x84   : > { %4277 = vsyncadd (%p5311_p11), %s299_s25, 4294966784  ;;  %s5312_s0 = sadd.s32 4294967295, %s4328_s28   ;;  %s4642_s29 = scalar_lea.vmem [#allocation4], %s3349_s11 }
  0x85   : > { %s307_s12 = sand.u32 1, %s5312_s0  }
  0x86   : > { %s308_s24 = scalar_lea.sflag [#allocation5], %s307_s12 }
  0x87   : > { %4279 = dma.done.wait (%p5311_p11), %s308_s24, 512  }
  0x88   : > { %4281 = vsyncadd (%p5311_p11), %s308_s24, 4294966784  ;;  %s318_s17 = sand.u32 1, %s4292_s19  }
  0x89   : > { %s4649_s30 = sshll.u32 %s318_s17, 4 }
  0x8a   : > { %s320_s6 = scalar_lea.vmem [#allocation6], %s4649_s30 }
  0x8b   : > { %4283 = dma.done.wait (%p4569_p1), %s308_s24, 256  }
  0x8c   : > { %4285 = vsyncadd (%p4569_p1), %s308_s24, 4294967040  ;;  %s5313_s21 = sld [smem:[#allocation10_spill]]  ;;  %v4335_v0 = vmov 0   ;;  %vm430_vm0 = vcmask 261120   ;;  %s5314_s1 = sld [smem:[#allocation16_spill]]  ;;  %v405_v1 = vld [vmem:[%s4642_s29] sm:$0xff] }
  0x8d   : > { %4098 = vset.pattern.permute.xlu0 %v4335_v0  ;;  %4099 = vset.pattern.permute.xlu1 %v4335_v0  ;;  %s5315_s16 = sld [smem:[#allocation17_spill]]  ;;  %v406_v2 = vld [vmem:[%s4642_s29 + $0x8] sm:$0x1f]  ;;  %v444_v4 = vsel %vm430_vm0, %v405_v1, 0  ;;  %v3358_v50 = vld [vmem:[%s4642_s29 + $0x10] sm:$0xff]  ;;  %vm1581_vm3 = vcmask 105472  }
  0x8e   : > { %v447_v5 = vsel %vm430_vm0, %v406_v2, 0  ;;  %v450_v10 = vand.u32 4294901760, %v444_v4  ;;  %v3359_v51 = vld [vmem:[%s4642_s29 + $0x18] sm:$0x1f]  ;;  %v1812_v53 = vsel %vm430_vm0, %v3358_v50, 0  ;;  %s5320_s25 = sld [smem:[#allocation11_spill]] }
  0x8f   : > { %v453_v11 = vand.u32 4294901760, %v447_v5  ;;  %v1815_v54 = vsel %vm430_vm0, %v3359_v51, 0  ;;  %v1818_v55 = vand.u32 4294901760, %v1812_v53 }
  0x90   : > { %v558_v20 = vsub.f32 %v444_v4, %v450_v10  ;;  %v1821_v56 = vand.u32 4294901760, %v1815_v54 }
  0x91   : > { %v4682_v18 = vpack.c.bf16 %v453_v11, %v450_v10  ;;  %v565_v21 = vsub.f32 %v447_v5, %v453_v11  ;;  %v1926_v57 = vsub.f32 %v1812_v53, %v1818_v55  ;;  %v407_v5 = vld [vmem:[%s4634_s2] sm:$0xff] }
  0x92   : > { %p372_p13 = scmp.lt.s32.totalorder %s5313_s21, 2  ;;  %v559_v28 = vand.u32 4294901760, %v558_v20  ;;  %v1933_v58 = vsub.f32 %v1815_v54, %v1821_v56  ;;  %v3840_v61 = vpack.c.bf16 %v1821_v56, %v1818_v55  ;;  %s391_s11 = sadd.s32 1, %s5313_s21 }
  0x93   : > { %3769 = vmatprep.subr.bf16.mxu0 %v4682_v18  ;;  %v566_v29 = vand.u32 4294901760, %v565_v21  ;;  %v3776_v47 = vpack.c.bf16 %v565_v21, %v558_v20  ;;  %v1927_v59 = vand.u32 4294901760, %v1926_v57 }
  0x94   : > { %s4658_s8 = scalar_select %p372_p13, %s5313_s21, 2  ;;  %3771 = vmatpush3.bf16.xpose.msra.mxu0 %v4682_v18  ;;  %v560_v35 = vsub.f32 %v558_v20, %v559_v28  ;;  %v1934_v60 = vand.u32 4294901760, %v1933_v58 }
  0x95   : > { %v567_v36 = vsub.f32 %v565_v21, %v566_v29  ;;  %v3784_v52 = vpack.c.bf16 %v566_v29, %v559_v28  ;;  %v1928_v62 = vsub.f32 %v1926_v57, %v1927_v59  ;;  %p383_p1 = scmp.lt.s32.totalorder %s5320_s25, 1 }
  0x96   : > { %s3370_s13 = sshll.u32 %s4658_s8, 5  ;;  %v561_v41 = vand.u32 4294901760, %v560_v35  ;;  %v1935_v63 = vsub.f32 %v1933_v58, %v1934_v60  ;;  %v3856_v4 = vpack.c.bf16 %v1934_v60, %v1927_v59 }
  0x97   : > { %s376_s18 = scalar_lea.vmem %s5314_s1, %s3370_s13  ;;  %s4667_s5 = scalar_lea.vmem %s5315_s16, %s3370_s13  ;;  %v568_v42 = vand.u32 4294901760, %v567_v36  ;;  %v1929_v0 = vand.u32 4294901760, %v1928_v62 }
  0x98   : > { %v392_v3 = vld [vmem:[%s376_s18] sm:$0xff]  ;;  %v393_v7 = vld [vmem:[%s376_s18 + $0x8] sm:$0xff]  ;;  %v394_v8 = vld [vmem:[%s376_s18 + $0x10] sm:$0xff]  ;;  %v1936_v1 = vand.u32 4294901760, %v1935_v63  ;;  %s5341_s25 = smov (!%p383_p1, %s5320_s25), 1  ;;  %s5321_s13 = sld [smem:[#allocation18_spill]] }
  0x99   : > { %v432_v6 = vsel %vm430_vm0, %v392_v3, 0  ;;  %v395_v9 = vld [vmem:[%s376_s18 + $0x18] sm:$0xff]  ;;  %v435_v13 = vsel %vm430_vm0, %v393_v7, 0  ;;  %v396_v14 = vld [vmem:[%s4667_s5] sm:$0xff]  ;;  %v438_v16 = vsel %vm430_vm0, %v394_v8, 0  ;;  %v398_v22 = vld [vmem:[%s4667_s5 + $0x10] sm:$0xff]  ;;  %v3772_v46 = vpack.c.bf16 %v568_v42, %v561_v41 }
  0x9a   : > { %v4674_v12 = vand.u32 4294901760, %v432_v6  ;;  %v4678_v15 = vand.u32 4294901760, %v435_v13  ;;  %v441_v17 = vsel %vm430_vm0, %v395_v9, 0  ;;  %412 = vperm.xlu0 %4098, %v396_v14   ;;  %v397_v23 = vld [vmem:[%s4667_s5 + $0x8] sm:$0xff]  ;;  %v4692_v25 = vand.u32 4294901760, %v438_v16  ;;  %422 = vperm.xlu1 %4099, %v398_v22   ;;  %v399_v30 = vld [vmem:[%s4667_s5 + $0x18] sm:$0xff] }
  0x9b   : > { %v4694_v26 = vand.u32 4294901760, %v441_v17  ;;  %3773 = vmatprep.subr.bf16.mxu0 %v3772_v46  ;;  %v3844_v2 = vpack.c.bf16 %v1936_v1, %v1929_v0  ;;  %v3848_v3 = vpack.c.bf16 %v1933_v58, %v1926_v57  ;;  %v3360_v63 = vld [vmem:[%s4634_s2 + $0x10] sm:$0xff] }
  0x9c   : > { %v4685_v19 = vsub.f32 %v432_v6, %v4674_v12  ;;  %v4690_v24 = vsub.f32 %v435_v13, %v4678_v15  ;;  %v4706_v32 = vsub.f32 %v438_v16, %v4692_v25  ;;  %v1042_v6 = vsel %vm430_vm0, %v407_v5, 0 }
  0x9d   : > { %v4709_v33 = vsub.f32 %v441_v17, %v4694_v26  ;;  %v4783_v7 = vand.u32 4294901760, %v1042_v6  ;;  %v2410_v0 = vsel %vm430_vm0, %v3360_v63, 0 }
  0x9e   : > { %v4698_v27 = vand.u32 4294901760, %v4685_v19  ;;  %v4703_v31 = vand.u32 4294901760, %v4690_v24  ;;  %417 = vperm.xlu0 %4098, %v397_v23   ;;  %v4716_v38 = vand.u32 4294901760, %v4706_v32  ;;  %427 = vperm.xlu1 %4099, %v399_v30   ;;  %v4833_v1 = vand.u32 4294901760, %v2410_v0 }
  0x9f   : > { %v4719_v39 = vand.u32 4294901760, %v4709_v33  ;;  %v4786_v8 = vsub.f32 %v1042_v6, %v4783_v7 }
  0xa0   : > { %v519_v34 = vsub.f32 %v4685_v19, %v4698_v27  ;;  %v529_v37 = vsub.f32 %v4690_v24, %v4703_v31  ;;  %v539_v44 = vsub.f32 %v4706_v32, %v4716_v38 }
  0xa1   : > { %v549_v45 = vsub.f32 %v4709_v33, %v4719_v39  ;;  %v1118_v9 = vand.u32 4294901760, %v4786_v8 }
  0xa2   : > { %v4721_v40 = vand.u32 4294901760, %v519_v34  ;;  %v4723_v43 = vand.u32 4294901760, %v529_v37  ;;  %v540_v48 = vand.u32 4294901760, %v539_v44 }
  0xa3   : > { %v550_v49 = vand.u32 4294901760, %v549_v45  ;;  %v1119_v10 = vsub.f32 %v4786_v8, %v1118_v9 }
  0xa4   : > { %3520 = vmatprep.mubr.f32.mxu0 %v4721_v40 }
  0xa5   : > { %3521 = vmatmul.mubr.f32.vlgmr.msra.gmra.mrb[0].mxu0 %v4723_v43  ;;  %v1120_v11 = vand.u32 4294901760, %v1119_v10 }
  0xa6   : > { %3775 = vmatpush3.bf16.xpose.msra.mxu0 %v3772_v46  ;;  %3523 = vmatprep.mubr.f32.mxu0 %v540_v48 }
  0xa7   : > { %3777 = vmatprep.subr.bf16.mxu0 %v3776_v47  ;;  %3584 = vmatprep.mubr.f32.mxu1 %v1120_v11 }
  0xa9   : > { %3524 = vmatmul.mubr.f32.gmra.mrb[2].mxu0 %v550_v49 }
  0xaa   : > { %3530 = vmatprep.mubr.f32.mxu0 %v4674_v12 }
  0xad   : > { %3531 = vmatmul.mubr.f32.vlgmr.msra.gmra.mrb[0].mxu0 %v4678_v15 }
  0xae   : > { %3779 = vmatpush3.bf16.xpose.msra.mxu0 %v3776_v47  ;;  %3533 = vmatprep.mubr.f32.mxu0 %v4692_v25 }
  0xaf   : > { %3781 = vmatprep.subr.bf16.mxu0 %v4682_v18 }
  0xb1   : > { %3534 = vmatmul.mubr.f32.gmra.mrb[2].mxu0 %v4694_v26 }
  0xb2   : > { %3540 = vmatprep.mubr.f32.mxu0 %v4685_v19 }
  0xb5   : > { %3541 = vmatmul.mubr.f32.vlgmr.msra.gmra.mrb[0].mxu0 %v4690_v24 }
  0xb6   : > { %3783 = vmatpush3.bf16.xpose.msra.mxu0 %v4682_v18  ;;  %3543 = vmatprep.mubr.f32.mxu0 %v4706_v32 }
  0xb7   : > { %3785 = vmatprep.subr.bf16.mxu0 %v3784_v52 }
  0xb9   : > { %3544 = vmatmul.mubr.f32.gmra.mrb[2].mxu0 %v4709_v33 }
  0xba   : > { %3550 = vmatprep.mubr.f32.mxu0 %v4698_v27 }
  0xbd   : > { %3551 = vmatmul.mubr.f32.vlgmr.msra.gmra.mrb[0].mxu0 %v4703_v31 }
  0xbe   : > { %3787 = vmatpush3.bf16.xpose.msra.mxu0 %v3784_v52  ;;  %3553 = vmatprep.mubr.f32.mxu0 %v4716_v38 }
  0xbf   : > { %3789 = vmatprep.subr.bf16.mxu0 %v4682_v18 }
  0xc1   : > { %3554 = vmatmul.mubr.f32.gmra.mrb[2].mxu0 %v4719_v39 }
  0xc2   : > { %3560 = vmatprep.mubr.f32.mxu0 %v4674_v12 }
  0xc5   : > { %3561 = vmatmul.mubr.f32.vlgmr.msra.gmra.mrb[0].mxu0 %v4678_v15 }
  0xc6   : > { %3791 = vmatpush3.bf16.xpose.msra.mxu0 %v4682_v18  ;;  %3563 = vmatprep.mubr.f32.mxu0 %v4692_v25 }
  0xc7   : > { %3841 = vmatprep.subr.bf16.mxu0 %v3840_v61 }
  0xc9   : > { %3564 = vmatmul.mubr.f32.gmra.mrb[2].mxu0 %v4694_v26 }
  0xca   : > { %3570 = vmatprep.mubr.f32.mxu0 %v4674_v12 }
  0xcd   : > { %3571 = vmatmul.mubr.f32.vlgmr.msra.gmra.mrb[0].mxu0 %v4678_v15 }
  0xce   : > { %3843 = vmatpush3.bf16.xpose.msra.mxu0 %v3840_v61  ;;  %3573 = vmatprep.mubr.f32.mxu0 %v4692_v25 }
  0xcf   : > { %3845 = vmatprep.subr.bf16.mxu0 %v3844_v2 }
  0xd1   : > { %3574 = vmatmul.mubr.f32.gmra.mrb[2].mxu0 %v4694_v26 }
  0xd2   : > { %3646 = vmatprep.mubr.f32.mxu0 %v4721_v40 }
  0xd5   : > { %3647 = vmatmul.mubr.f32.vlgmr.msra.gmra.mrb[4].mxu0 %v4723_v43 }
  0xd6   : > { %3847 = vmatpush3.bf16.xpose.msra.mxu0 %v3844_v2  ;;  %3649 = vmatprep.mubr.f32.mxu0 %v540_v48  ;;  %v3361_v2 = vld [vmem:[%s4634_s2 + $0x18] sm:$0xff] }
  0xd7   : > { %3849 = vmatprep.subr.bf16.mxu0 %v3848_v3 }
  0xd9   : > { %3650 = vmatmul.mubr.f32.gmra.mrb[6].mxu0 %v550_v49 }
  0xda   : > { %3656 = vmatprep.mubr.f32.mxu0 %v4674_v12 }
  0xdd   : > { %3657 = vmatmul.mubr.f32.vlgmr.msra.gmra.mrb[4].mxu0 %v4678_v15 }
  0xde   : > { %3851 = vmatpush3.bf16.xpose.msra.mxu0 %v3848_v3  ;;  %3659 = vmatprep.mubr.f32.mxu0 %v4692_v25  ;;  %v4838_v3 = vsub.f32 %v2410_v0, %v4833_v1 }
  0xdf   : > { %3853 = vmatprep.subr.bf16.mxu0 %v3840_v61 }
  0xe0   : > { %v2486_v6 = vand.u32 4294901760, %v4838_v3 }
  0xe1   : > { %3660 = vmatmul.mubr.f32.gmra.mrb[6].mxu0 %v4694_v26 }
  0xe2   : > { %3666 = vmatprep.mubr.f32.mxu0 %v4685_v19 }
  0xe5   : > { %3667 = vmatmul.mubr.f32.vlgmr.msra.gmra.mrb[4].mxu0 %v4690_v24 }
  0xe6   : > { %3855 = vmatpush3.bf16.xpose.msra.mxu0 %v3840_v61  ;;  %3669 = vmatprep.mubr.f32.mxu0 %v4706_v32 }
  0xe7   : > { %3857 = vmatprep.subr.bf16.mxu0 %v3856_v4 }
  0xe9   : > { %3670 = vmatmul.mubr.f32.gmra.mrb[6].mxu0 %v4709_v33 }
  0xea   : > { %3676 = vmatprep.mubr.f32.mxu0 %v4698_v27 }
  0xed   : > { %3677 = vmatmul.mubr.f32.vlgmr.msra.gmra.mrb[4].mxu0 %v4703_v31 }
  0xee   : > { %3859 = vmatpush3.bf16.xpose.msra.mxu0 %v3856_v4  ;;  %3679 = vmatprep.mubr.f32.mxu0 %v4716_v38  ;;  %v2413_v4 = vsel %vm430_vm0, %v3361_v2, 0 }
  0xef   : > { %3861 = vmatprep.subr.bf16.mxu0 %v3840_v61  ;;  %v4841_v5 = vand.u32 4294901760, %v2413_v4 }
  0xf1   : > { %3680 = vmatmul.mubr.f32.gmra.mrb[6].mxu0 %v4719_v39 }
  0xf2   : > { %3686 = vmatprep.mubr.f32.mxu0 %v4674_v12 }
  0xf5   : > { %3687 = vmatmul.mubr.f32.vlgmr.msra.gmra.mrb[4].mxu0 %v4678_v15 }
  0xf6   : > { %3863 = vmatpush3.bf16.xpose.msra.mxu0 %v3840_v61  ;;  %3689 = vmatprep.mubr.f32.mxu0 %v4692_v25 }
  0xf9   : > { %3690 = vmatmul.mubr.f32.gmra.mrb[6].mxu0 %v4694_v26 }
  0xfa   : > { %3696 = vmatprep.mubr.f32.mxu0 %v4674_v12  ;;  %v408_v12 = vld [vmem:[%s4634_s2 + $0x8] sm:$0xff]  ;;  %s3980_s2 = smul.u32 3, %s5341_s25 }
  0xfb   : > { %v1045_v14 = vsel %vm430_vm0, %v408_v12, 0  ;;  %v4849_v12 = vsub.f32 %v2413_v4, %v4841_v5 }
  0xfc   : > { %v4798_v16 = vand.u32 4294901760, %v1045_v14  ;;  %s388_s29 = sadd.s32 %s3980_s2, %s4658_s8 }
  0xfd   : > { %3697 = vmatmul.mubr.f32.vlgmr.msra.gmra.mrb[4].mxu0 %v4678_v15  ;;  %s3356_s17 = sshll.u32 %s388_s29, 3 }
  0xfe   : > { %3699 = vmatprep.mubr.f32.mxu0 %v4692_v25  ;;  %v4805_v22 = vsub.f32 %v1045_v14, %v4798_v16  ;;  %s390_s14 = scalar_lea.vmem %s5321_s13, %s3356_s17 }
 0x100   : > { %v1128_v32 = vand.u32 4294901760, %v4805_v22 }
 0x101   : > { %3700 = vmatmul.mubr.f32.gmra.mrb[6].mxu0 %v4694_v26 }
 0x102   : > { %v1129_v42 = vsub.f32 %v4805_v22, %v1128_v32 }
 0x104   : > { %v1130_v53 = vand.u32 4294901760, %v1129_v42 }
 0x119   : > { %v4793_v13 = vpop.permute.xlu0 %412  ;;  %v4796_v15 = vpop.permute.xlu1 %422 }
 0x11d   : > { %v4800_v17 = vpop.permute.xlu0 %417  ;;  %v4807_v24 = vpop.permute.xlu1 %427 }
 0x1a0   : > { %v3572_v18 = vpop.f32.mrb[0].mxu0 }
 0x1a1   : > { %v3912_v19 = vadd.f32 %v3572_v18, %v4800_v17  ;;  %v1015_v20 = vpop.f32.mrb[1].mxu0  ;;  %v2487_v18 = vsub.f32 %v4838_v3, %v2486_v6 }
 0x1a2   : > { %v3913_v21 = vadd.f32 %v1015_v20, %v4793_v13 }
 0x1a3   : > { %v1038_v23 = vmul.f32 0.17677669, %v3912_v19 }
 0x1a4   : > { %v1037_v25 = vmul.f32 0.17677669, %v3913_v21  ;;  %v3575_v26 = vpop.f32.mrb[2].mxu0 }
 0x1a5   : > { %v1051_v27 = vand.u32 4294901760, %v1038_v23  ;;  %v3914_v28 = vadd.f32 %v3575_v26, %v4807_v24  ;;  %v1027_v29 = vpop.f32.mrb[3].mxu0 }
 0x1a6   : > { %v1048_v30 = vand.u32 4294901760, %v1037_v25  ;;  %v3915_v31 = vadd.f32 %v1027_v29, %v4796_v15 }
 0x1a7   : > { %v1145_v33 = vsub.f32 %v1038_v23, %v1051_v27  ;;  %v1040_v34 = vmul.f32 0.17677669, %v3914_v28 }
 0x1a8   : > { %v4812_v35 = vpack.c.bf16 %v1051_v27, %v1048_v30  ;;  %v1138_v36 = vsub.f32 %v1037_v25, %v1048_v30  ;;  %v1039_v37 = vmul.f32 0.17677669, %v3915_v31  ;;  %v2496_v25 = vand.u32 4294901760, %v4849_v12 }
 0x1a9   : > { %v1146_v38 = vand.u32 4294901760, %v1145_v33  ;;  %v1057_v39 = vand.u32 4294901760, %v1040_v34 }
 0x1aa   : > { %v1139_v40 = vand.u32 4294901760, %v1138_v36  ;;  %v1054_v41 = vand.u32 4294901760, %v1039_v37  ;;  %3793 = vmatprep.subr.bf16.mxu1 %v4812_v35  ;;  %v3808_v43 = vpack.c.bf16 %v1145_v33, %v1138_v36 }
 0x1ab   : > { %v1159_v44 = vsub.f32 %v1040_v34, %v1057_v39  ;;  %3795 = vmatpush3.bf16.msra.mxu1 %v4812_v35  ;;  %v1147_v45 = vsub.f32 %v1145_v33, %v1146_v38 }
 0x1ac   : > { %v4817_v46 = vpack.c.bf16 %v1057_v39, %v1054_v41  ;;  %v1152_v47 = vsub.f32 %v1039_v37, %v1054_v41  ;;  %v1140_v48 = vsub.f32 %v1138_v36, %v1139_v40  ;;  %v3824_v49 = vpack.c.bf16 %v1146_v38, %v1139_v40 }
 0x1ad   : > { %v1160_v50 = vand.u32 4294901760, %v1159_v44  ;;  %v1148_v51 = vand.u32 4294901760, %v1147_v45 }
 0x1ae   : > { %v1153_v52 = vand.u32 4294901760, %v1152_v47  ;;  %3797 = vmatprep.subr.bf16.mxu1 %v4817_v46  ;;  %v1141_v54 = vand.u32 4294901760, %v1140_v48  ;;  %v3812_v55 = vpack.c.bf16 %v1159_v44, %v1152_v47 }
 0x1af   : > { %3799 = vmatpush3.bf16.msra.mxu1 %v4817_v46  ;;  %v1161_v56 = vsub.f32 %v1159_v44, %v1160_v50 }
 0x1b0   : > { %v3800_v57 = vpack.c.bf16 %v1148_v51, %v1141_v54  ;;  %v1154_v58 = vsub.f32 %v1152_v47, %v1153_v52  ;;  %v3828_v59 = vpack.c.bf16 %v1160_v50, %v1153_v52 }
 0x1b1   : > { %v1162_v60 = vand.u32 4294901760, %v1161_v56  ;;  %v4878_v56 = vstv %s391_s11 }
 0x1b2   : > { %3585 = vmatmul.mubr.f32.vlgmr.msra.gmra.mrb[0].mxu1 %v1130_v53  ;;  %3801 = vmatprep.subr.bf16.mxu1 %v3800_v57  ;;  %v1155_v61 = vand.u32 4294901760, %v1154_v58  ;;  %v400_v53 = vlaneseq }
 0x1b3   : > { %3803 = vmatpush3.bf16.msra.mxu1 %v3800_v57  ;;  %3595 = vmatprep.mubr.f32.mxu1 %v4783_v7 }
 0x1b4   : > { %v3804_v62 = vpack.c.bf16 %v1162_v60, %v1155_v61  ;;  %v4874_v54 = vshrl.u32 %v400_v53, 7  ;;  %v404_v57 = vand.u32 127, %v400_v53 }
 0x1b6   : > { %3805 = vmatprep.subr.bf16.mxu1 %v3804_v62  ;;  %v1611_v60 = vsub.s32 1, %v4874_v54  ;;  %v1628_v61 = vsub.s32 2, %v4874_v54  ;;  %v1662_v63 = vsub.s32 4, %v4874_v54  ;;  %v4887_v0 = vadd.s32 8, %v4874_v54 }
 0x1b7   : > { %3807 = vmatpush3.bf16.msra.mxu1 %v3804_v62  ;;  %v1645_v62 = vsub.s32 3, %v4874_v54  ;;  %v1679_v2 = vsub.s32 5, %v4874_v54 }
 0x1b8   : > { %3809 = vmatprep.subr.bf16.mxu1 %v3808_v43 }
 0x1ba   : > { %3596 = vmatmul.mubr.f32.vlgmr.msra.gmra.mrb[0].mxu1 %v4798_v16 }
 0x1bb   : > { %3811 = vmatpush3.bf16.msra.mxu1 %v3808_v43  ;;  %3606 = vmatprep.mubr.f32.mxu1 %v4786_v8 }
 0x1bc   : > { %3813 = vmatprep.subr.bf16.mxu1 %v3812_v55 }
 0x1bf   : > { %3815 = vmatpush3.bf16.msra.mxu1 %v3812_v55  ;;  %v409_v55 = vld [vmem:[%s320_s6] sm:$0xff] }
 0x1c0   : > { %3817 = vmatprep.subr.bf16.mxu1 %v4812_v35  ;;  %v1591_v58 = vadd.s32 %v4878_v56, %v409_v55 }
 0x1c2   : > { %3607 = vmatmul.mubr.f32.vlgmr.msra.gmra.mrb[0].mxu1 %v4805_v22  ;;  %v1612_v4 = vrot.slane %v1591_v58, %v1611_v60 }
 0x1c3   : > { %3819 = vmatpush3.bf16.msra.mxu1 %v4812_v35  ;;  %3617 = vmatprep.mubr.f32.mxu1 %v1118_v9 }
 0x1c4   : > { %3821 = vmatprep.subr.bf16.mxu1 %v4817_v46  ;;  %vm1614_vm5 = vcmp.eq.s32.totalorder %v4887_v0, %v1612_v4  ;;  %vm1613_vm7 = vcmp.eq.s32.totalorder %v4874_v54, %v1612_v4 }
 0x1c7   : > { %3823 = vmatpush3.bf16.msra.mxu1 %v4817_v46 }
 0x1c8   : > { %3825 = vmatprep.subr.bf16.mxu1 %v3824_v49 }
 0x1ca   : > { %3618 = vmatmul.mubr.f32.vlgmr.msra.gmra.mrb[0].mxu1 %v1128_v32 }
 0x1cb   : > { %3827 = vmatpush3.bf16.msra.mxu1 %v3824_v49  ;;  %3628 = vmatprep.mubr.f32.mxu1 %v4783_v7 }
 0x1cc   : > { %3829 = vmatprep.subr.bf16.mxu1 %v3828_v59 }
 0x1cf   : > { %3831 = vmatpush3.bf16.msra.mxu1 %v3828_v59  ;;  %v1594_v59 = vsub.s32 0, %v4874_v54 }
 0x1d0   : > { %3833 = vmatprep.subr.bf16.mxu1 %v4812_v35  ;;  %v3698_v8 = vpop.f32.mrb[4].mxu0 }
 0x1d1   : > { %v3916_v9 = vadd.f32 %v3698_v8, %v4800_v17  ;;  %v2383_v10 = vpop.f32.mrb[5].mxu0  ;;  %v1663_v8 = vrot.slane %v1591_v58, %v1662_v63 }
 0x1d2   : > { %v3917_v11 = vadd.f32 %v2383_v10, %v4793_v13  ;;  %3629 = vmatmul.mubr.f32.vlgmr.msra.gmra.mrb[0].mxu1 %v4798_v16  ;;  %v1696_v10 = vsub.s32 6, %v4874_v54 }
 0x1d3   : > { %v2406_v14 = vmul.f32 0.17677669, %v3916_v9  ;;  %3835 = vmatpush3.bf16.msra.mxu1 %v4812_v35  ;;  %3639 = vmatprep.mubr.f32.mxu1 %v4783_v7  ;;  %v2488_v7 = vand.u32 4294901760, %v2487_v18  ;;  %v4907_v9 = vrot.slane %v1591_v58, %v1679_v2  ;;  %vm1664_vm12 = vcmp.eq.s32.totalorder %v4874_v54, %v1663_v8 }
 0x1d4   : > { %v2405_v19 = vmul.f32 0.17677669, %v3917_v11  ;;  %3837 = vmatprep.subr.bf16.mxu1 %v4817_v46  ;;  %v3701_v17 = vpop.f32.mrb[6].mxu0  ;;  %vm1665_vm13 = vcmp.eq.s32.totalorder %v4887_v0, %v1663_v8 }
 0x1d5   : > { %v2419_v20 = vand.u32 4294901760, %v2406_v14  ;;  %v3918_v13 = vadd.f32 %v3701_v17, %v4807_v24  ;;  %v2395_v21 = vpop.f32.mrb[7].mxu0  ;;  %v2497_v24 = vsub.f32 %v4849_v12, %v2496_v25  ;;  %vm1681_vm14 = vcmp.eq.s32.totalorder %v4874_v54, %v4907_v9 }
 0x1d6   : > { %v2416_v22 = vand.u32 4294901760, %v2405_v19  ;;  %v3919_v23 = vadd.f32 %v2395_v21, %v4796_v15  ;;  %vm1682_vm15 = vcmp.eq.s32.totalorder %v4887_v0, %v4907_v9 }
 0x1d7   : > { %v2513_v26 = vsub.f32 %v2406_v14, %v2419_v20  ;;  %v2408_v27 = vmul.f32 0.17677669, %v3918_v13  ;;  %3839 = vmatpush3.bf16.msra.mxu1 %v4817_v46  ;;  %v2498_v44 = vand.u32 4294901760, %v2497_v24  ;;  %v1713_v14 = vsub.s32 7, %v4874_v54 }
 0x1d8   : > { %v3864_v28 = vpack.c.bf16 %v2419_v20, %v2416_v22  ;;  %v2506_v29 = vsub.f32 %v2405_v19, %v2416_v22  ;;  %v2407_v30 = vmul.f32 0.17677669, %v3919_v23 }
 0x1d9   : > { %v2514_v31 = vand.u32 4294901760, %v2513_v26  ;;  %v2425_v32 = vand.u32 4294901760, %v2408_v27 }
 0x1da   : > { %v2507_v33 = vand.u32 4294901760, %v2506_v29  ;;  %v2422_v34 = vand.u32 4294901760, %v2407_v30  ;;  %3640 = vmatmul.mubr.f32.vlgmr.msra.gmra.mrb[0].mxu1 %v4798_v16  ;;  %3865 = vmatprep.subr.bf16.mxu1 %v3864_v28  ;;  %v3880_v15 = vpack.c.bf16 %v2513_v26, %v2506_v29 }
 0x1db   : > { %v2527_v35 = vsub.f32 %v2408_v27, %v2425_v32  ;;  %3867 = vmatpush3.bf16.msra.mxu1 %v3864_v28  ;;  %3710 = vmatprep.mubr.f32.mxu1 %v2488_v7  ;;  %v2515_v36 = vsub.f32 %v2513_v26, %v2514_v31 }
 0x1dc   : > { %v3868_v37 = vpack.c.bf16 %v2425_v32, %v2422_v34  ;;  %v2520_v38 = vsub.f32 %v2407_v30, %v2422_v34  ;;  %v2508_v39 = vsub.f32 %v2506_v29, %v2507_v33  ;;  %v3896_v40 = vpack.c.bf16 %v2514_v31, %v2507_v33 }
 0x1dd   : > { %v2528_v41 = vand.u32 4294901760, %v2527_v35  ;;  %v2516_v42 = vand.u32 4294901760, %v2515_v36 }
 0x1de   : > { %v2521_v43 = vand.u32 4294901760, %v2520_v38  ;;  %3869 = vmatprep.subr.bf16.mxu1 %v3868_v37  ;;  %v2509_v45 = vand.u32 4294901760, %v2508_v39  ;;  %v3884_v46 = vpack.c.bf16 %v2527_v35, %v2520_v38 }
 0x1df   : > { %3871 = vmatpush3.bf16.msra.mxu1 %v3868_v37  ;;  %v2529_v16 = vsub.f32 %v2527_v35, %v2528_v41 }
 0x1e0   : > { %v3872_v47 = vpack.c.bf16 %v2516_v42, %v2509_v45  ;;  %v2522_v48 = vsub.f32 %v2520_v38, %v2521_v43  ;;  %v3900_v49 = vpack.c.bf16 %v2528_v41, %v2521_v43  ;;  %v1714_v38 = vrot.slane %v1591_v58, %v1713_v14 }
 0x1e1   : > { %v2530_v50 = vand.u32 4294901760, %v2529_v16 }
 0x1e2   : > { %3711 = vmatmul.mubr.f32.vlgmr.msra.gmra.mrb[2].mxu1 %v2498_v44  ;;  %3873 = vmatprep.subr.bf16.mxu1 %v3872_v47  ;;  %v2523_v51 = vand.u32 4294901760, %v2522_v48 }
 0x1e3   : > { %3875 = vmatpush3.bf16.msra.mxu1 %v3872_v47  ;;  %3721 = vmatprep.mubr.f32.mxu1 %v4833_v1 }
 0x1e4   : > { %v3876_v52 = vpack.c.bf16 %v2530_v50, %v2523_v51 }
 0x1e6   : > { %3877 = vmatprep.subr.bf16.mxu1 %v3876_v52 }
 0x1e7   : > { %3879 = vmatpush3.bf16.msra.mxu1 %v3876_v52 }
 0x1e8   : > { %3881 = vmatprep.subr.bf16.mxu1 %v3880_v15 }
 0x1ea   : > { %3722 = vmatmul.mubr.f32.vlgmr.msra.gmra.mrb[2].mxu1 %v4841_v5 }
 0x1eb   : > { %3883 = vmatpush3.bf16.msra.mxu1 %v3880_v15  ;;  %3732 = vmatprep.mubr.f32.mxu1 %v4838_v3  ;;  %v1595_v3 = vrot.slane %v1591_v58, %v1594_v59 }
 0x1ec   : > { %3885 = vmatprep.subr.bf16.mxu1 %v3884_v46 }
 0x1ed   : > { %vm1597_vm4 = vcmp.eq.s32.totalorder %v4887_v0, %v1595_v3  ;;  %vm1596_vm6 = vcmp.eq.s32.totalorder %v4874_v54, %v1595_v3 }
 0x1ef   : > { %3887 = vmatpush3.bf16.msra.mxu1 %v3884_v46 }
 0x1f0   : > { %3889 = vmatprep.subr.bf16.mxu1 %v3864_v28 }
 0x1f2   : > { %3733 = vmatmul.mubr.f32.vlgmr.msra.gmra.mrb[2].mxu1 %v4849_v12  ;;  %v4930_v12 = vrot.slane %v1591_v58, %v1696_v10 }
 0x1f3   : > { %3891 = vmatpush3.bf16.msra.mxu1 %v3864_v28  ;;  %3743 = vmatprep.mubr.f32.mxu1 %v2486_v6  ;;  %v1646_v6 = vrot.slane %v1591_v58, %v1645_v62 }
 0x1f4   : > { %3893 = vmatprep.subr.bf16.mxu1 %v3868_v37  ;;  %vm1699_vm0 = vcmp.eq.s32.totalorder %v4887_v0, %v4930_v12 }
 0x1f5   : > { %vm1647_vm10 = vcmp.eq.s32.totalorder %v4874_v54, %v1646_v6  ;;  %vm1648_vm11 = vcmp.eq.s32.totalorder %v4887_v0, %v1646_v6 }
 0x1f7   : > { %3895 = vmatpush3.bf16.msra.mxu1 %v3868_v37 }
 0x1f8   : > { %3897 = vmatprep.subr.bf16.mxu1 %v3896_v40 }
 0x1fa   : > { %3744 = vmatmul.mubr.f32.vlgmr.msra.gmra.mrb[2].mxu1 %v2496_v25 }
 0x1fb   : > { %3899 = vmatpush3.bf16.msra.mxu1 %v3896_v40  ;;  %3754 = vmatprep.mubr.f32.mxu1 %v4833_v1 }
 0x1fc   : > { %3901 = vmatprep.subr.bf16.mxu1 %v3900_v49 }
 0x1ff   : > { %3903 = vmatpush3.bf16.msra.mxu1 %v3900_v49 }
 0x200   : > { %3905 = vmatprep.subr.bf16.mxu1 %v3864_v28 }
 0x202   : > { %3755 = vmatmul.mubr.f32.vlgmr.msra.gmra.mrb[2].mxu1 %v4841_v5 }
 0x203   : > { %3907 = vmatpush3.bf16.msra.mxu1 %v3864_v28  ;;  %3765 = vmatprep.mubr.f32.mxu1 %v4833_v1  ;;  %v4890_v1 = vadd.s32 %v4878_v56, %v404_v57 }
 0x204   : > { %3909 = vmatprep.subr.bf16.mxu1 %v3868_v37 }
 0x205   : > { %vm5282_vm1 = vcmp.eq.s32.totalorder %v4887_v0, %v4890_v1  ;;  %vm1577_vm2 = vcmp.eq.s32.totalorder %v4874_v54, %v4890_v1 }
 0x207   : > { %3911 = vmatpush3.bf16.msra.mxu1 %v3868_v37 }
 0x20a   : > { %3766 = vmatmul.mubr.f32.vlgmr.msra.gmra.mrb[2].mxu1 %v4841_v5  ;;  %v1629_v5 = vrot.slane %v1591_v58, %v1628_v61 }
 0x20c   : > { %vm1630_vm8 = vcmp.eq.s32.totalorder %v4874_v54, %v1629_v5  ;;  %vm1631_vm9 = vcmp.eq.s32.totalorder %v4887_v0, %v1629_v5 }
 0x2ad   : > { %v4922_v11 = vpop.f32.mrb[0].mxu1 }
 0x2ae   : > { %v4933_v18 = vpop.f32.mrb[1].mxu1  ;;  %v1580_v19 = vsel %vm5282_vm1, %v4922_v11, 0.0  ;;  %v1599_v17 = vsel %vm1597_vm4, %v4922_v11, 0.0  ;;  %v1616_v20 = vsel %vm1614_vm5, %v4922_v11, 0.0  ;;  %v1633_v13 = vsel %vm1631_vm9, %v4922_v11, 0.0 }
 0x2af   : > { %v1579_v21 = vsel %vm1577_vm2, %v4933_v18, 0.0  ;;  %v1583_v22 = vsel %vm1581_vm3, %v1580_v19, 0.0  ;;  %v1598_v23 = vsel %vm1596_vm6, %v4933_v18, 0.0  ;;  %v1601_v25 = vsel %vm1581_vm3, %v1599_v17, 0.0 }
 0x2b0   : > { %v1582_v26 = vsel %vm1581_vm3, %v1579_v21, 0.0  ;;  %v1600_v27 = vsel %vm1581_vm3, %v1598_v23, 0.0  ;;  %v1615_v7 = vsel %vm1613_vm7, %v4933_v18, 0.0  ;;  %v1618_v28 = vsel %vm1581_vm3, %v1616_v20, 0.0 }
 0x2b1   : > { %v1584_v29 = vadd.f32 %v1583_v22, %v1582_v26  ;;  %v1602_v30 = vadd.f32 %v1601_v25, %v1600_v27  ;;  %v1617_v31 = vsel %vm1581_vm3, %v1615_v7, 0.0  ;;  %v1632_v32 = vsel %vm1630_vm8, %v4933_v18, 0.0 }
 0x2b2   : > { %v1619_v33 = vadd.f32 %v1618_v28, %v1617_v31  ;;  %v1634_v34 = vsel %vm1581_vm3, %v1632_v32, 0.0  ;;  %v1635_v24 = vsel %vm1581_vm3, %v1633_v13, 0.0  ;;  %v1649_v15 = vsel %vm1647_vm10, %v4933_v18, 0.0 }
 0x2b3   : > { %v1603_v35 = vrot.slane %v1602_v30, 4  ;;  %v1636_v36 = vadd.f32 %v1635_v24, %v1634_v34  ;;  %v1650_v37 = vsel %vm1648_vm11, %v4922_v11, 0.0  ;;  %v1651_v40 = vsel %vm1581_vm3, %v1649_v15, 0.0 }
 0x2b4   : > { %v1620_v39 = vrot.slane %v1619_v33, 4  ;;  %v1652_v41 = vsel %vm1581_vm3, %v1650_v37, 0.0  ;;  %v1666_v42 = vsel %vm1664_vm12, %v4933_v18, 0.0  ;;  %v1667_v16 = vsel %vm1665_vm13, %v4922_v11, 0.0 }
 0x2b5   : > { %v1604_v43 = vadd.f32 %v1603_v35, %v1602_v30  ;;  %v1637_v44 = vrot.slane %v1636_v36, 4  ;;  %v1653_v45 = vadd.f32 %v1652_v41, %v1651_v40  ;;  %v1683_v47 = vsel %vm1681_vm14, %v4933_v18, 0.0 }
 0x2b6   : > { %v1621_v46 = vadd.f32 %v1620_v39, %v1619_v33  ;;  %vm1698_vm4 = vcmp.eq.s32.totalorder %v4874_v54, %v4930_v12  ;;  %v1668_v51 = vsel %vm1581_vm3, %v1666_v42, 0.0  ;;  %v1669_v53 = vsel %vm1581_vm3, %v1667_v16, 0.0 }
 0x2b7   : > { %v1605_v48 = vrot.slane %v1604_v43, 2  ;;  %v1638_v49 = vadd.f32 %v1637_v44, %v1636_v36  ;;  %v1654_v50 = vrot.slane %v1653_v45, 4  ;;  %v1684_v55 = vsel %vm1682_vm15, %v4922_v11, 0.0 }
 0x2b8   : > { %v1622_v52 = vrot.slane %v1621_v46, 2  ;;  %vm1715_vm5 = vcmp.eq.s32.totalorder %v4874_v54, %v1714_v38  ;;  %v1685_v4 = vsel %vm1581_vm3, %v1683_v47, 0.0  ;;  %v1585_v5 = vrot.slane %v1584_v29, 4 }
 0x2b9   : > { %v1606_v57 = vadd.f32 %v1605_v48, %v1604_v43  ;;  %v1639_v58 = vrot.slane %v1638_v49, 2  ;;  %v1655_v3 = vadd.f32 %v1654_v50, %v1653_v45  ;;  %v1670_v8 = vadd.f32 %v1669_v53, %v1668_v51 }
 0x2ba   : > { %v1623_v6 = vadd.f32 %v1622_v52, %v1621_v46  ;;  %v1686_v19 = vsel %vm1581_vm3, %v1684_v55, 0.0  ;;  %v1700_v9 = vsel %vm1698_vm4, %v4933_v18, 0.0  ;;  %v1701_v25 = vsel %vm1699_vm0, %v4922_v11, 0.0 }
 0x2bb   : > { %v1607_v17 = vrot.slane %v1606_v57, 1  ;;  %v1640_v20 = vadd.f32 %v1639_v58, %v1638_v49  ;;  %v1656_v13 = vrot.slane %v1655_v3, 2  ;;  %v1671_v22 = vrot.slane %v1670_v8, 4 }
 0x2bc   : > { %v1624_v21 = vrot.slane %v1623_v6, 1  ;;  %v1687_v23 = vadd.f32 %v1686_v19, %v1685_v4  ;;  %vm1716_vm6 = vcmp.eq.s32.totalorder %v4887_v0, %v1714_v38  ;;  %v1702_v32 = vsel %vm1581_vm3, %v1700_v9, 0.0 }
 0x2bd   : > { %v5008_v26 = vadd.f32 %v1607_v17, %v1606_v57  ;;  %v1641_v27 = vrot.slane %v1640_v20, 1  ;;  %v1657_v7 = vadd.f32 %v1656_v13, %v1655_v3  ;;  %v1672_v30 = vadd.f32 %v1671_v22, %v1670_v8 }
 0x2be   : > { %v5011_v28 = vadd.f32 %v1624_v21, %v1623_v6  ;;  %v1688_v31 = vrot.slane %v1687_v23, 4  ;;  %v1586_v33 = vadd.f32 %v1585_v5, %v1584_v29  ;;  %v1703_v24 = vsel %vm1581_vm3, %v1701_v25, 0.0  ;;  %v3362_v5 = vld [vmem:[%s320_s6 + $0x8] sm:$0xff] }
 0x2bf   : > { %v1658_v34 = vrot.slane %v1657_v7, 1  ;;  %v1717_v12 = vsel %vm1715_vm5, %v4933_v18, 0.0  ;;  %v1673_v15 = vrot.slane %v1672_v30, 2  ;;  %v1704_v36 = vadd.f32 %v1703_v24, %v1702_v32 }
 0x2c0   : > { %v1689_v35 = vadd.f32 %v1688_v31, %v1687_v23  ;;  %v1718_v37 = vsel %vm1716_vm6, %v4922_v11, 0.0  ;;  %v5019_v39 = vadd.f32 %v1641_v27, %v1640_v20  ;;  %v1719_v40 = vsel %vm1581_vm3, %v1717_v12, 0.0 }
 0x2c1   : > { %v1720_v41 = vsel %vm1581_vm3, %v1718_v37, 0.0  ;;  %v1728_v29 = vmax.f32 %v5008_v26, %v5011_v28  ;;  %v1674_v42 = vadd.f32 %v1673_v15, %v1672_v30  ;;  %v1705_v44 = vrot.slane %v1704_v36, 4 }
 0x2c2   : > { %v1690_v43 = vrot.slane %v1689_v35, 2  ;;  %v1721_v45 = vadd.f32 %v1720_v41, %v1719_v40  ;;  %v1587_v38 = vrot.slane %v1586_v33, 2  ;;  %v1659_v18 = vadd.f32 %v1658_v34, %v1657_v7 }
 0x2c3   : > { %v1729_v46 = vmax.f32 %v1728_v29, %v5019_v39  ;;  %v1675_v16 = vrot.slane %v1674_v42, 1  ;;  %v1706_v47 = vadd.f32 %v1705_v44, %v1704_v36  ;;  %v2954_v17 = vadd.s32 %v3362_v5, %v4878_v56 }
 0x2c4   : > { %v1691_v11 = vadd.f32 %v1690_v43, %v1689_v35  ;;  %v1722_v48 = vrot.slane %v1721_v45, 4  ;;  %v1588_v55 = vadd.f32 %v1587_v38, %v1586_v33  ;;  %vm5281_vm7 = vcmask 98304  }
 0x2c5   : > { %v1730_v49 = vmax.f32 %v1729_v46, %v1659_v18  ;;  %v1676_v50 = vadd.f32 %v1675_v16, %v1674_v42  ;;  %v1707_v52 = vrot.slane %v1706_v47, 2  ;;  %v2958_v23 = vrot.slane %v2954_v17, %v1594_v59 }
 0x2c6   : > { %v1692_v51 = vrot.slane %v1691_v11, 1  ;;  %v1723_v53 = vadd.f32 %v1722_v48, %v1721_v45  ;;  %v1589_v20 = vrot.slane %v1588_v55, 1  ;;  %v5036_v7 = vrot.slane %v2954_v17, %v1713_v14 }
 0x2c7   : > { %v1708_v58 = vadd.f32 %v1707_v52, %v1706_v47  ;;  %v1731_v4 = vmax.f32 %v1730_v49, %v1676_v50  ;;  %v4336_v30 = vmov 0.0   ;;  %vm2960_vm9 = vcmp.eq.s32.totalorder %v4887_v0, %v2958_v23 }
 0x2c8   : > { %v1693_v57 = vadd.f32 %v1692_v51, %v1691_v11  ;;  %v1724_v3 = vrot.slane %v1723_v53, 2  ;;  %v5031_v25 = vadd.f32 %v1589_v20, %v1588_v55  ;;  %v2975_v59 = vrot.slane %v2954_v17, %v1611_v60 }
 0x2c9   : > { %v1709_v6 = vrot.slane %v1708_v58, 1  ;;  %v2992_v32 = vrot.slane %v2954_v17, %v1628_v61  ;;  %vm2959_vm10 = vcmp.eq.s32.totalorder %v4874_v54, %v2958_v23  ;;  %v3026_v41 = vrot.slane %v2954_v17, %v1662_v63 }
 0x2ca   : > { %v1725_v8 = vadd.f32 %v1724_v3, %v1723_v53  ;;  %v1732_v19 = vmax.f32 %v1731_v4, %v1693_v57  ;;  %vm2976_vm11 = vcmp.eq.s32.totalorder %v4874_v54, %v2975_v59  ;;  %vm2977_vm12 = vcmp.eq.s32.totalorder %v4887_v0, %v2975_v59 }
 0x2cb   : > { %v1710_v13 = vadd.f32 %v1709_v6, %v1708_v58  ;;  %v5074_v42 = vrot.slane %v2954_v17, %v1696_v10  ;;  %vm2993_vm13 = vcmp.eq.s32.totalorder %v4874_v54, %v2992_v32  ;;  %vm2994_vm14 = vcmp.eq.s32.totalorder %v4887_v0, %v2992_v32 }
 0x2cc   : > { %v1726_v9 = vrot.slane %v1725_v8, 1  ;;  %vm3027_vm4 = vcmp.eq.s32.totalorder %v4874_v54, %v3026_v41  ;;  %vm3028_vm5 = vcmp.eq.s32.totalorder %v4887_v0, %v3026_v41 }
 0x2cd   : > { %v1733_v22 = vmax.f32 %v1732_v19, %v1710_v13  ;;  %vm3062_vm1 = vcmp.eq.s32.totalorder %v4887_v0, %v5074_v42 }
 0x2ce   : > { %v1727_v21 = vadd.f32 %v1726_v9, %v1725_v8 }
 0x2d0   : > { %v1734_v27 = vmax.f32 %v1733_v22, %v1727_v21 }
 0x2d2   : > { %vm1775_vm8 = vcmp.ge.f32.partialorder %v5031_v25, %v1734_v27  ;;  %v5039_v56 = vmax.f32 %v5031_v25, %v1734_v27 }
 0x2d3   : > { %v3357_v31 = vsel %vm1775_vm8, 1.0, %v4336_v30 }
 0x2d4   : > { %v1791_v33 = vsel %vm5281_vm7, %v3357_v31, 0.0  ;;  %v1736_v14 = vsub.f32 %v5031_v25, %v5039_v56  ;;  %v1739_v34 = vsub.f32 %v5008_v26, %v5039_v56  ;;  %v1743_v24 = vsub.f32 %v5011_v28, %v5039_v56 }
 0x2d5   : > { %1792 = vadd.xlane.f32.xlu1 %v1791_v33  ;;  %v1747_v60 = vsub.f32 %v5019_v39, %v5039_v56  ;;  %v1751_v12 = vsub.f32 %v1659_v18, %v5039_v56  ;;  %v1755_v61 = vsub.f32 %v1676_v50, %v5039_v56  ;;  %v1759_v15 = vsub.f32 %v1693_v57, %v5039_v56 }
 0x2d6   : > { %v1737_v35 = vmul.f32 1.442695, %v1736_v14  ;;  %v1740_v36 = vmul.f32 1.442695, %v1739_v34  ;;  %v1763_v37 = vsub.f32 %v1710_v13, %v5039_v56  ;;  %v3009_v26 = vrot.slane %v2954_v17, %v1645_v62 }
 0x2d7   : > { %v1744_v28 = vmul.f32 1.442695, %v1743_v24  ;;  %v1767_v40 = vsub.f32 %v1727_v21, %v5039_v56  ;;  %v5068_v39 = vrot.slane %v2954_v17, %v1679_v2  ;;  %v1748_v29 = vmul.f32 1.442695, %v1747_v60 }
 0x2d8   : > { %4100 = vpow2.f32 %v1737_v35  ;;  %v1752_v62 = vmul.f32 1.442695, %v1751_v12  ;;  %v1756_v63 = vmul.f32 1.442695, %v1755_v61  ;;  %vm3010_vm15 = vcmp.eq.s32.totalorder %v4874_v54, %v3009_v26 }
 0x2d9   : > { %4102 = vpow2.f32 %v1740_v36  ;;  %vm3011_vm0 = vcmp.eq.s32.totalorder %v4887_v0, %v3009_v26  ;;  %v1760_v2 = vmul.f32 1.442695, %v1759_v15  ;;  %v1764_v10 = vmul.f32 1.442695, %v1763_v37 }
 0x2da   : > { %4104 = vpow2.f32 %v1744_v28  ;;  %vm3044_vm6 = vcmp.eq.s32.totalorder %v4874_v54, %v5068_v39  ;;  %vm3045_vm8 = vcmp.eq.s32.totalorder %v4887_v0, %v5068_v39  ;;  %v5086_v43 = vmul.f32 1.442695, %v1767_v40 }
 0x2db   : > { %4106 = vpow2.f32 %v1748_v29  ;;  %vm3061_vm7 = vcmp.eq.s32.totalorder %v4874_v54, %v5074_v42 }
 0x2dc   : > { %4108 = vpow2.f32 %v1752_v62 }
 0x2dd   : > { %v5088_v44 = vpop.f32.mrb[2].mxu1  ;;  %4110 = vpow2.f32 %v1756_v63 }
 0x2de   : > { %v5094_v45 = vpop.f32.mrb[3].mxu1  ;;  %v2962_v38 = vsel %vm2960_vm9, %v5088_v44, 0.0  ;;  %v2979_v18 = vsel %vm2977_vm12, %v5088_v44, 0.0  ;;  %v2996_v46 = vsel %vm2994_vm14, %v5088_v44, 0.0  ;;  %4112 = vpow2.f32 %v1760_v2 }
 0x2df   : > { %v2961_v16 = vsel %vm2959_vm10, %v5094_v45, 0.0  ;;  %v2964_v11 = vsel %vm1581_vm3, %v2962_v38, 0.0  ;;  %v2978_v47 = vsel %vm2976_vm11, %v5094_v45, 0.0  ;;  %vm3078_vm9 = vcmp.eq.s32.totalorder %v4874_v54, %v5036_v7 }
 0x2e0   : > { %4114 = vpow2.f32 %v1764_v10  ;;  %v2963_v48 = vsel %vm1581_vm3, %v2961_v16, 0.0  ;;  %v2980_v49 = vsel %vm1581_vm3, %v2978_v47, 0.0  ;;  %v2981_v50 = vsel %vm1581_vm3, %v2979_v18, 0.0 }
 0x2e1   : > { %vm3079_vm12 = vcmp.eq.s32.totalorder %v4887_v0, %v5036_v7  ;;  %v2965_v51 = vadd.f32 %v2964_v11, %v2963_v48  ;;  %v2982_v52 = vadd.f32 %v2981_v50, %v2980_v49  ;;  %v2995_v53 = vsel %vm2993_vm13, %v5094_v45, 0.0 }
 0x2e2   : > { %v2998_v55 = vsel %vm1581_vm3, %v2996_v46, 0.0  ;;  %v2997_v57 = vsel %vm1581_vm3, %v2995_v53, 0.0  ;;  %v3012_v58 = vsel %vm3010_vm15, %v5094_v45, 0.0  ;;  %v3013_v3 = vsel %vm3011_vm0, %v5088_v44, 0.0  ;;  %v5133_v5 = vpop.eup %4100 }
 0x2e3   : > { %v3029_v4 = vsel %vm3027_vm4, %v5094_v45, 0.0  ;;  %v2966_v6 = vrot.slane %v2965_v51, 4  ;;  %v2983_v8 = vrot.slane %v2982_v52, 4  ;;  %v2999_v19 = vadd.f32 %v2998_v55, %v2997_v57  ;;  %v4103_v20 = vpop.eup %4102 }
 0x2e4   : > { %v3014_v17 = vsel %vm1581_vm3, %v3012_v58, 0.0  ;;  %v3015_v13 = vsel %vm1581_vm3, %v3013_v3, 0.0  ;;  %v3030_v9 = vsel %vm3028_vm5, %v5088_v44, 0.0  ;;  %v3031_v21 = vsel %vm1581_vm3, %v3029_v4, 0.0  ;;  %v4105_v23 = vpop.eup %4104 }
 0x2e5   : > { %v3046_v22 = vsel %vm3044_vm6, %v5094_v45, 0.0  ;;  %v2967_v27 = vadd.f32 %v2966_v6, %v2965_v51  ;;  %v2984_v31 = vadd.f32 %v2983_v8, %v2982_v52  ;;  %v3000_v59 = vrot.slane %v2999_v19, 4  ;;  %v5145_v33 = vpop.eup %4106 }
 0x2e6   : > { %v3016_v32 = vadd.f32 %v3015_v13, %v3014_v17  ;;  %v3032_v14 = vsel %vm1581_vm3, %v3030_v9, 0.0  ;;  %v3047_v34 = vsel %vm3045_vm8, %v5088_v44, 0.0  ;;  %v3048_v24 = vsel %vm1581_vm3, %v3046_v22, 0.0  ;;  %v5157_v12 = vpop.eup %4108 }
 0x2e7   : > { %v3063_v60 = vsel %vm3061_vm7, %v5094_v45, 0.0  ;;  %v2968_v61 = vrot.slane %v2967_v27, 2  ;;  %v2985_v15 = vrot.slane %v2984_v31, 2  ;;  %v3001_v35 = vadd.f32 %v3000_v59, %v2999_v19  ;;  %v5159_v37 = vpop.eup %4110 }
 0x2e8   : > { %v3017_v36 = vrot.slane %v3016_v32, 4  ;;  %v3033_v26 = vadd.f32 %v3032_v14, %v3031_v21  ;;  %v3049_v28 = vsel %vm1581_vm3, %v3047_v34, 0.0  ;;  %v3064_v40 = vsel %vm3062_vm1, %v5088_v44, 0.0  ;;  %v5167_v39 = vpop.eup %4112 }
 0x2e9   : > { %v3065_v41 = vsel %vm1581_vm3, %v3063_v60, 0.0  ;;  %v2969_v29 = vadd.f32 %v2968_v61, %v2967_v27  ;;  %v2986_v62 = vadd.f32 %v2985_v15, %v2984_v31  ;;  %v3002_v63 = vrot.slane %v3001_v35, 2 }
 0x2ea   : > { %v3018_v2 = vadd.f32 %v3017_v36, %v3016_v32  ;;  %v5169_v10 = vpop.eup %4114  ;;  %v3034_v38 = vrot.slane %v3033_v26, 4  ;;  %v3050_v18 = vadd.f32 %v3049_v28, %v3048_v24  ;;  %v3066_v46 = vsel %vm1581_vm3, %v3064_v40, 0.0 }
 0x2eb   : > { %v3080_v42 = vsel %vm3078_vm9, %v5094_v45, 0.0  ;;  %v2970_v16 = vrot.slane %v2969_v29, 1  ;;  %v2987_v11 = vrot.slane %v2986_v62, 1  ;;  %v3003_v47 = vadd.f32 %v3002_v63, %v3001_v35 }
 0x2ec   : > { %v3019_v48 = vrot.slane %v3018_v2, 2  ;;  %v3035_v49 = vadd.f32 %v3034_v38, %v3033_v26  ;;  %v3051_v50 = vrot.slane %v3050_v18, 4  ;;  %v3067_v51 = vadd.f32 %v3066_v46, %v3065_v41 }
 0x2ed   : > { %v3081_v52 = vsel %vm3079_vm12, %v5088_v44, 0.0  ;;  %v5180_v53 = vadd.f32 %v2970_v16, %v2969_v29  ;;  %v5182_v55 = vadd.f32 %v2987_v11, %v2986_v62  ;;  %v3004_v57 = vrot.slane %v3003_v47, 1 }
 0x2ee   : > { %v3020_v58 = vadd.f32 %v3019_v48, %v3018_v2  ;;  %v3036_v3 = vrot.slane %v3035_v49, 2  ;;  %v3052_v4 = vadd.f32 %v3051_v50, %v3050_v18  ;;  %v3068_v6 = vrot.slane %v3067_v51, 4 }
 0x2ef   : > { %v3082_v8 = vsel %vm1581_vm3, %v3080_v42, 0.0  ;;  %v5185_v19 = vadd.f32 %v3004_v57, %v3003_v47  ;;  %v3083_v13 = vsel %vm1581_vm3, %v3081_v52, 0.0  ;;  %v3091_v7 = vmax.f32 %v5180_v53, %v5182_v55 }
 0x2f0   : > { %v3021_v17 = vrot.slane %v3020_v58, 1  ;;  %v3037_v9 = vadd.f32 %v3036_v3, %v3035_v49  ;;  %v3053_v21 = vrot.slane %v3052_v4, 2  ;;  %v3069_v22 = vadd.f32 %v3068_v6, %v3067_v51 }
 0x2f1   : > { %v3084_v27 = vadd.f32 %v3083_v13, %v3082_v8  ;;  %v3092_v59 = vmax.f32 %v3091_v7, %v5185_v19  ;;  %v1742_v32 = vadd.f32 %v4103_v20, %v5133_v5  ;;  %v2943_v14 = vsel %vm1577_vm2, %v5094_v45, 0.0 }
 0x2f2   : > { %v5190_v31 = vadd.f32 %v3021_v17, %v3020_v58  ;;  %v3038_v34 = vrot.slane %v3037_v9, 1  ;;  %v3054_v24 = vadd.f32 %v3053_v21, %v3052_v4  ;;  %v3070_v60 = vrot.slane %v3069_v22, 2 }
 0x2f3   : > { %v3085_v61 = vrot.slane %v3084_v27, 4  ;;  %v1746_v15 = vadd.f32 %v4105_v23, %v1742_v32  ;;  %vm5316_vm1 = vcmp.eq.s32.totalorder %v4887_v0, %v4890_v1  ;;  %v2945_v36 = vsel %vm1581_vm3, %v2943_v14, 0.0 }
 0x2f4   : > { %v2944_v35 = vsel %vm5316_vm1, %v5088_v44, 0.0  ;;  %v3093_v26 = vmax.f32 %v3092_v59, %v5190_v31  ;;  %4116 = vpow2.f32 %v5086_v43  ;;  %v3055_v5 = vrot.slane %v3054_v24, 1 }
 0x2f5   : > { %v3071_v20 = vadd.f32 %v3070_v60, %v3069_v22  ;;  %v3086_v28 = vadd.f32 %v3085_v61, %v3084_v27  ;;  %v3039_v45 = vadd.f32 %v3038_v34, %v3037_v9  ;;  %v1750_v40 = vadd.f32 %v5145_v33, %v1746_v15 }
 0x2f6   : > { %v2946_v41 = vsel %vm1581_vm3, %v2944_v35, 0.0  ;;  %v3056_v1 = vadd.f32 %v3055_v5, %v3054_v24  ;;  %vm5317_vm3 = vcmask 98304   ;;  %vm3166_vm11 = vcmp.eq.s32.totalorder %v4874_v54, 1 }
 0x2f7   : > { %v3087_v23 = vrot.slane %v3086_v28, 2  ;;  %v2947_v29 = vadd.f32 %v2946_v41, %v2945_v36  ;;  %v3072_v62 = vrot.slane %v3071_v20, 1  ;;  %v1754_v0 = vadd.f32 %v5157_v12, %v1750_v40  ;;  %vm5318_vm7 = vmmov %vm5317_vm3 }
 0x2f8   : > { %v3094_v44 = vmax.f32 %v3093_v26, %v3039_v45  ;;  %vm5319_vm10 = vmmov %vm5317_vm3  ;;  %vm3165_vm13 = vcmp.eq.s32.totalorder %v4874_v54, 0 }
 0x2f9   : > { %v2948_v63 = vrot.slane %v2947_v29, 4  ;;  %v3088_v2 = vadd.f32 %v3087_v23, %v3086_v28  ;;  %v1758_v38 = vadd.f32 %v5159_v37, %v1754_v0  ;;  %v3073_v43 = vadd.f32 %v3072_v62, %v3071_v20 }
 0x2fa   : > { %v3095_v18 = vmax.f32 %v3094_v44, %v3056_v1 }
 0x2fb   : > { %v2949_v46 = vadd.f32 %v2948_v63, %v2947_v29  ;;  %v3089_v42 = vrot.slane %v3088_v2, 1  ;;  %v1762_v16 = vadd.f32 %v5167_v39, %v1758_v38 }
 0x2fc   : > { %v3096_v33 = vmax.f32 %v3095_v18, %v3073_v43 }
 0x2fd   : > { %v2950_v11 = vrot.slane %v2949_v46, 2  ;;  %v3090_v47 = vadd.f32 %v3089_v42, %v3088_v2  ;;  %v1766_v48 = vadd.f32 %v5169_v10, %v1762_v16 }
 0x2fe   : > { %v4117_v49 = vpop.eup %4116 }
 0x2ff   : > { %v2951_v50 = vadd.f32 %v2950_v11, %v2949_v46  ;;  %v3097_v12 = vmax.f32 %v3096_v33, %v3090_v47  ;;  %v1770_v51 = vadd.f32 %v4117_v49, %v1766_v48 }
 0x301   : > { %v2952_v52 = vrot.slane %v2951_v50, 1  ;;  %4118 = vlog2.f32 %v1770_v51 }
 0x303   : > { %v2953_v57 = vadd.f32 %v2952_v52, %v2951_v50 }
 0x305   : > { %v3098_v58 = vmax.f32 %v2953_v57, %v3097_v12  ;;  %vm3138_vm2 = vcmp.ge.f32.partialorder %v2953_v57, %v3097_v12 }
 0x306   : > { %v3363_v37 = vsel %vm3138_vm2, 1.0, %v4336_v30 }
 0x307   : > { %v3099_v3 = vsub.f32 %v2953_v57, %v3098_v58  ;;  %v3102_v4 = vsub.f32 %v5180_v53, %v3098_v58  ;;  %v3106_v39 = vsub.f32 %v5182_v55, %v3098_v58  ;;  %v3110_v6 = vsub.f32 %v5185_v19, %v3098_v58 }
 0x308   : > { %v3114_v10 = vsub.f32 %v5190_v31, %v3098_v58  ;;  %v3118_v8 = vsub.f32 %v3039_v45, %v3098_v58  ;;  %v3122_v17 = vsub.f32 %v3056_v1, %v3098_v58  ;;  %v3126_v13 = vsub.f32 %v3073_v43, %v3098_v58 }
 0x309   : > { %v3100_v7 = vmul.f32 1.442695, %v3099_v3  ;;  %v3103_v9 = vmul.f32 1.442695, %v3102_v4  ;;  %v3130_v21 = vsub.f32 %v3090_v47, %v3098_v58  ;;  %v3107_v22 = vmul.f32 1.442695, %v3106_v39 }
 0x30a   : > { %v3111_v30 = vmul.f32 1.442695, %v3110_v6  ;;  %v3115_v53 = vmul.f32 1.442695, %v3114_v10  ;;  %v3119_v19 = vmul.f32 1.442695, %v3118_v8 }
 0x30b   : > { %4120 = vpow2.f32 %v3100_v7  ;;  %v4119_v27 = vpop.eup %4118  ;;  %v3123_v32 = vmul.f32 1.442695, %v3122_v17  ;;  %v3127_v34 = vmul.f32 1.442695, %v3126_v13  ;;  %v3131_v61 = vmul.f32 1.442695, %v3130_v21 }
 0x30c   : > { %4122 = vpow2.f32 %v3103_v9  ;;  %v1772_v59 = vmul.f32 0.6931472, %v4119_v27  ;;  %v3153_v38 = vsel %vm5319_vm10, %v3363_v37, 0.0 }
 0x30d   : > { %4124 = vpow2.f32 %v3107_v22 }
 0x30e   : > { %v1773_v55 = vadd.f32 %v1772_v59, %v5039_v56  ;;  %4126 = vpow2.f32 %v3111_v30 }
 0x30f   : > { %4128 = vpow2.f32 %v3115_v53 }
 0x310   : > { %v1774_v31 = vsub.f32 %v1773_v55, %v5031_v25  ;;  %4130 = vpow2.f32 %v3119_v19 }
 0x311   : > { %4132 = vpow2.f32 %v3123_v32 }
 0x312   : > { %v1779_v14 = vsel %vm5317_vm3, %v1774_v31, 0.0  ;;  %4134 = vpow2.f32 %v3127_v34 }
 0x313   : > { %1780 = vadd.xlane.f32.xlu0 %v1779_v14  ;;  %4136 = vpow2.f32 %v3131_v61 }
 0x315   : > { %v4121_v24 = vpop.eup %4120 }
 0x316   : > { %v4123_v60 = vpop.eup %4122 }
 0x317   : > { %v3105_v15 = vadd.f32 %v4123_v60, %v4121_v24  ;;  %v4125_v35 = vpop.eup %4124 }
 0x318   : > { %v4127_v56 = vpop.eup %4126 }
 0x319   : > { %v3109_v36 = vadd.f32 %v4125_v35, %v3105_v15  ;;  %v4129_v5 = vpop.eup %4128 }
 0x31a   : > { %v4131_v20 = vpop.eup %4130 }
 0x31b   : > { %v3113_v26 = vadd.f32 %v4127_v56, %v3109_v36  ;;  %v4133_v45 = vpop.eup %4132 }
 0x31c   : > { %v4135_v41 = vpop.eup %4134 }
 0x31d   : > { %v3117_v25 = vadd.f32 %v4129_v5, %v3113_v26  ;;  %v4137_v29 = vpop.eup %4136 }
 0x31f   : > { %v3121_v28 = vadd.f32 %v4131_v20, %v3117_v25 }
 0x321   : > { %v3125_v40 = vadd.f32 %v4133_v45, %v3121_v28 }
 0x323   : > { %v3129_v23 = vadd.f32 %v4135_v41, %v3125_v40 }
 0x325   : > { %v3133_v62 = vadd.f32 %v4137_v29, %v3129_v23 }
 0x327   : > { %4138 = vlog2.f32 %v3133_v62 }
 0x331   : > { %v4139_v0 = vpop.eup %4138 }
 0x332   : > { %v3135_v1 = vmul.f32 0.6931472, %v4139_v0 }
 0x334   : > { %v3136_v44 = vadd.f32 %v3135_v1, %v3098_v58 }
 0x336   : > { %v3137_v63 = vsub.f32 %v3136_v44, %v2953_v57 }
 0x338   : > { %v3141_v2 = vsel %vm5318_vm7, %v3137_v63, 0.0 }
 0x339   : > { %3142 = vadd.xlane.f32.xlu0 %v3141_v2 }
 0x33d   : > { %3154 = vadd.xlane.f32.xlu0 %v3153_v38 }
 0x362   : > { %v1793_v43 = vpop.xlane.xlu1 %1792 }
 0x363   : > { %v1794_v18 = vrot.slane %v1793_v43, 4 }
 0x365   : > { %v1795_v46 = vadd.f32 %v1794_v18, %v1793_v43 }
 0x367   : > { %v1796_v42 = vrot.slane %v1795_v46, 2 }
 0x369   : > { %v1797_v47 = vadd.f32 %v1796_v42, %v1795_v46 }
 0x36b   : > { %v1798_v50 = vrot.slane %v1797_v47, 1 }
 0x36d   : > { %v1799_v52 = vadd.f32 %v1798_v50, %v1797_v47 }
 0x3a0   : > { %v1781_v16 = vpop.xlane.xlu0 %1780 }
 0x3a1   : > { %v1782_v33 = vrot.slane %v1781_v16, 4 }
 0x3a3   : > { %v1783_v11 = vadd.f32 %v1782_v33, %v1781_v16 }
 0x3a5   : > { %v1784_v48 = vrot.slane %v1783_v11, 2 }
 0x3a7   : > { %v1785_v49 = vadd.f32 %v1784_v48, %v1783_v11 }
 0x3a9   : > { %v1786_v12 = vrot.slane %v1785_v49, 1 }
 0x3ab   : > { %v1787_v51 = vadd.f32 %v1786_v12, %v1785_v49 }
 0x3ad   : > { %3981 = vpush %v1787_v51 }
 0x3ae   : > { %3983 = vpush %v1799_v52 }
 0x3c6   : > { %v3143_v57 = vpop.xlane.xlu0 %3142 }
 0x3c7   : > { %v3144_v58 = vrot.slane %v3143_v57, 4 }
 0x3c9   : > { %v3145_v37 = vadd.f32 %v3144_v58, %v3143_v57 }
 0x3ca   : > { %v3155_v3 = vpop.xlane.xlu0 %3154 }
 0x3cb   : > { %v3146_v4 = vrot.slane %v3145_v37, 2  ;;  %v3156_v39 = vrot.slane %v3155_v3, 4 }
 0x3cd   : > { %v3157_v6 = vadd.f32 %v3156_v39, %v3155_v3  ;;  %v3147_v10 = vadd.f32 %v3146_v4, %v3145_v37 }
 0x3cf   : > { %v3158_v8 = vrot.slane %v3157_v6, 2  ;;  %v3148_v17 = vrot.slane %v3147_v10, 1 }
 0x3d1   : > { %v3159_v13 = vadd.f32 %v3158_v8, %v3157_v6  ;;  %v3149_v7 = vadd.f32 %v3148_v17, %v3147_v10 }
 0x3d3   : > { %3985 = vpush %v3149_v7  ;;  %v3160_v9 = vrot.slane %v3159_v13, 1 }
 0x3d5   : > { %v3161_v21 = vadd.f32 %v3160_v9, %v3159_v13 }
 0x3d7   : > { %3987 = vpush %v3161_v21 }
 0x3de   : > { %s3982_s0 = spop %3981 }
 0x3df   : > { %s3984_s12 = spop %3983  ;;  %v1789_v59 = vstv %s3982_s0 }
 0x3e0   : > { %v1801_v27 = vstv %s3984_s12 }
 0x404   : > { %s3986_s24 = spop %3985 }
 0x405   : > { %v3151_v22 = vstv %s3986_s24 }
 0x406   : > { %v3152_v55 = vadd.f32 %v3151_v22, %v1789_v59 }
 0x408   : > { %s3988_s30 = spop %3987 }
 0x409   : > { %v3163_v30 = vstv %s3988_s30 }
 0x40a   : > { %v3164_v53 = vadd.f32 %v3163_v30, %v1801_v27 }
 0x40c   : > { %v3167_v19 = vsel %vm3166_vm11, %v3164_v53, 0.0 }
 0x40d   : > { %v3168_v31 = vsel %vm3165_vm13, %v3152_v55, %v3167_v19 }
 0x40e   : > { %3169 = vst [vmem:[%s390_s14] sm:$0xff] %v3168_v31 }
 0x40f PF: > { %s21_s28 = sadd.s32 1, %s4328_s28   ;;  %s5322_s8 = sld [smem:[#allocation12_spill]] }
 0x410   : > { %p18_p5 = scmp.ge.s32.totalorder %s21_s28, 8   ;;  %s5323_s10 = sld [smem:[#allocation13_spill]] }
 0x411   : > { %s5324_s18 = smov %s4292_s19  ;;  %s5325_s19 = smov %s4296_s20 }
 0x412   : > { %s5326_s20 = smov %s4585_s3  ;;  %s5327_s21 = smov %s4304_s22 }
 0x413   : > { %s5328_s22 = smov %s4308_s23  ;;  %s5329_s23 = smov %s4582_s7 }
 0x414   : > { %s5330_s24 = smov %s4320_s26  ;;  %s5331_s25 = smov %s4324_s27 }
 0x415   : > { %s5332_s26 = smov %s5322_s8  ;;  %20 = sbr.rel (!%p18_p5) target bundleno = 15 (0xf), region = 113 }
 0x416   : > { %s5333_s27 = smov %s5323_s10 }
 0x41c   :  { %3197 = vsyncpa [#allocation3], 1 }
 0x41d   :  { %3199 = vsyncpa [#allocation3 + $0x1], 1 }
 0x41e   :  { %3200 = vsyncpa [#allocation5], 1 }
 0x41f   :  { %3202 = vsyncpa [#allocation5 + $0x1], 1 }

</bundles_post_ra>
